<compile_context>
chip_gen: v6e
topology: v6e:2x2x1
jax: 0.10.0
libtpu: 0.0.40
codegen_flags: <defaults>
</compile_context>

<pallas_src>
import math
import numpy as np

import jax
import jax.numpy as jnp
from jax import lax
from jax.experimental import pallas as pl
from jax.experimental.pallas import tpu as pltpu

NUM_GROUPS = 32
EPS = 1e-5
_QKV_CHUNK = 512    # HW-row chunk for the projection matmuls in kernel 1
_Q_TILE_MAX = 256   # query-tile cap: fills 256-wide MXU, bounds score temps on v7x


# --------------------------------------------------------------------------- #
# Kernel 1: GroupNorm + fused q/k/v projections (per batch element)
# --------------------------------------------------------------------------- #
def gn_qkv_kernel(x_ref, gamma_ref, beta_ref, gmat_ref, gmatT_ref,
                  wq_ref, bq_ref, wk_ref, bk_ref, wv_ref, bv_ref,
                  q_ref, kT_ref, v_ref):
    HW = x_ref.shape[1]
    C = x_ref.shape[2]
    G = gmat_ref.shape[1]
    n_elems = float(HW * (C // G))

    ch = _QKV_CHUNK if (HW % _QKV_CHUNK == 0 and HW > _QKV_CHUNK) else HW
    n_ch = HW // ch

    # ---- GroupNorm statistics: two-pass, centered variance (f32) ----
    ch_sum = jnp.sum(x_ref[0], axis=0, keepdims=True)                    # (1, C)
    g_mean = jnp.dot(ch_sum, gmat_ref[...],
                     preferred_element_type=jnp.float32) / n_elems       # (1, G)
    mean_c = jnp.dot(g_mean, gmatT_ref[...],
                     preferred_element_type=jnp.float32)                 # (1, C)

    def var_body(i, acc):
        r0 = pl.multiple_of(i * ch, ch)
        d = x_ref[0, pl.ds(r0, ch), :] - mean_c
        return acc + jnp.sum(d * d, axis=0, keepdims=True)

    ch_sq = lax.fori_loop(0, n_ch, var_body,
                          jnp.zeros((1, C), jnp.float32), unroll=True)   # (1, C)
    g_var = jnp.dot(ch_sq, gmat_ref[...],
                    preferred_element_type=jnp.float32) / n_elems        # (1, G)
    var_c = jnp.dot(g_var, gmatT_ref[...],
                    preferred_element_type=jnp.float32)                  # (1, C)

    a = lax.rsqrt(var_c + EPS) * gamma_ref[...]     # fused affine scale (1, C)
    beta = beta_ref[...]                            # fused affine shift (1, C)

    # ---- q/k/v projections, chunked over HW, bf16 results written directly ----
    def qkv_body(i, carry):
        r0 = pl.multiple_of(i * ch, ch)
        h = ((x_ref[0, pl.ds(r0, ch), :] - mean_c) * a + beta).astype(jnp.bfloat16)
        q = jnp.dot(h, wq_ref[...], preferred_element_type=jnp.float32) + bq_ref[...]
        q_ref[0, pl.ds(r0, ch), :] = q.astype(jnp.bfloat16)   # q already * C^-0.5
        k = jnp.dot(h, wk_ref[...], preferred_element_type=jnp.float32) + bk_ref[...]
        kT_ref[0, :, pl.ds(r0, ch)] = jnp.transpose(k).astype(jnp.bfloat16)
        v = jnp.dot(h, wv_ref[...], preferred_element_type=jnp.float32) + bv_ref[...]
        v_ref[0, pl.ds(r0, ch), :] = v.astype(jnp.bfloat16)
        return carry

    lax.fori_loop(0, n_ch, qkv_body, 0, unroll=True)


# --------------------------------------------------------------------------- #
# Kernel 2: one (tq, HW) attention tile + proj_out + residual
# --------------------------------------------------------------------------- #
def attn_tile_kernel(q_ref, kT_ref, v_ref, xres_ref, wp_ref, bp_ref, o_ref):
    s = jnp.dot(q_ref[0], kT_ref[0], preferred_element_type=jnp.float32)  # (tq, HW)
    s = s - jnp.max(s, axis=-1, keepdims=True)
    e = jnp.exp(s)                                                         # f32 softmax
    inv = pl.reciprocal(jnp.sum(e, axis=-1, keepdims=True), approx=True)
    p = (e * inv).astype(jnp.bfloat16)

    attn = jnp.dot(p, v_ref[0], preferred_element_type=jnp.float32)       # (tq, C)
    proj = jnp.dot(attn.astype(jnp.bfloat16), wp_ref[...],
                   preferred_element_type=jnp.float32) + bp_ref[...]      # (tq, C)
    o_ref[0] = xres_ref[0] + proj


def _pick_q_tile(hw):
    if hw <= _Q_TILE_MAX:
        return hw
    for cand in (256, 128, 64, 32, 16, 8):
        if hw % cand == 0:
            return cand
    return hw


# --------------------------------------------------------------------------- #
# Wrapper
# --------------------------------------------------------------------------- #
def attn_block_pallas(x_nchw, params):
    B, C, H, W = x_nchw.shape
    HW = H * W
    G = NUM_GROUPS
    tq = _pick_q_tile(HW)
    n_qt = HW // tq

    # NCHW -> (B, HW, C) glue (spatial on sublanes, channels on lanes)
    x_tok = jnp.transpose(x_nchw, (0, 2, 3, 1)).reshape(B, HW, C).astype(jnp.float32)

    # group-membership one-hot (C, G) and its transpose, for GroupNorm stats
    ch_group = jnp.arange(C) // (C // G)
    gmat = jax.nn.one_hot(ch_group, G, dtype=jnp.float32)     # (C, G)
    gmatT = gmat.T                                             # (G, C)

    gamma = params["gamma"].reshape(1, C).astype(jnp.float32)
    beta = params["beta"].reshape(1, C).astype(jnp.float32)

    scale = C ** (-0.5)
    wq = (params["wq"].T * scale).astype(jnp.bfloat16)         # scale folded into q
    bq = (params["bq"] * scale).reshape(1, C).astype(jnp.float32)
    wk = params["wk"].T.astype(jnp.bfloat16)
    bk = params["bk"].reshape(1, C).astype(jnp.float32)
    wv = params["wv"].T.astype(jnp.bfloat16)
    bv = params["bv"].reshape(1, C).astype(jnp.float32)
    wp = params["wp"].T.astype(jnp.bfloat16)
    bp = params["bp"].reshape(1, C).astype(jnp.float32)

    const1 = lambda shape: pl.BlockSpec(shape, lambda b: (0, 0))

    # ---- phase 1: GroupNorm + q / kT / v (bf16 in HBM) ----
    q, kT, v = pl.pallas_call(
        gn_qkv_kernel,
        out_shape=(
            jax.ShapeDtypeStruct((B, HW, C), jnp.bfloat16),    # q (pre-scaled)
            jax.ShapeDtypeStruct((B, C, HW), jnp.bfloat16),    # k transposed
            jax.ShapeDtypeStruct((B, HW, C), jnp.bfloat16),    # v
        ),
        grid_spec=pltpu.PrefetchScalarGridSpec(
            num_scalar_prefetch=0,
            grid=(B,),
            in_specs=[
                pl.BlockSpec((1, HW, C), lambda b: (b, 0, 0)),  # x tokens
                const1((1, C)),        # gamma
                const1((1, C)),        # beta
                const1((C, G)),        # group one-hot
                const1((G, C)),        # group one-hot transposed
                const1((C, C)), const1((1, C)),   # wq, bq  (bf16 / f32)
                const1((C, C)), const1((1, C)),   # wk, bk
                const1((C, C)), const1((1, C)),   # wv, bv
            ],
            out_specs=(
                pl.BlockSpec((1, HW, C), lambda b: (b, 0, 0)),
                pl.BlockSpec((1, C, HW), lambda b: (b, 0, 0)),
                pl.BlockSpec((1, HW, C), lambda b: (b, 0, 0)),
            ),
        ),
        compiler_params=pltpu.CompilerParams(
            dimension_semantics=("parallel",),
            vmem_limit_bytes=64 * 1024 * 1024,
        ),
    )(x_tok, gamma, beta, gmat, gmatT, wq, bq, wk, bk, wv, bv)

    const2 = lambda shape: pl.BlockSpec(shape, lambda b, qi: (0, 0))

    # ---- phase 2: query-tiled attention + proj_out + residual ----
    out = pl.pallas_call(
        attn_tile_kernel,
        out_shape=jax.ShapeDtypeStruct((B, HW, C), jnp.float32),
        grid_spec=pltpu.PrefetchScalarGridSpec(
            num_scalar_prefetch=0,
            grid=(B, n_qt),
            in_specs=[
                pl.BlockSpec((1, tq, C), lambda b, qi: (b, qi, 0)),  # q tile
                pl.BlockSpec((1, C, HW), lambda b, qi: (b, 0, 0)),   # kT (full, bf16)
                pl.BlockSpec((1, HW, C), lambda b, qi: (b, 0, 0)),   # v  (full, bf16)
                pl.BlockSpec((1, tq, C), lambda b, qi: (b, qi, 0)),  # residual x tile
                const2((C, C)),        # proj_out weight (bf16)
                const2((1, C)),        # proj_out bias
            ],
            out_specs=pl.BlockSpec((1, tq, C), lambda b, qi: (b, qi, 0)),
        ),
        compiler_params=pltpu.CompilerParams(
            dimension_semantics=("parallel", "parallel"),
            vmem_limit_bytes=48 * 1024 * 1024,
        ),
    )(q, kT, v, x_tok, wp, bp)

    # (B, HW, C) -> NCHW glue
    return jnp.transpose(out.reshape(B, H, W, C), (0, 3, 1, 2))


# --------------------------------------------------------------------------- #
# Pure-JAX reference (mirrors the PyTorch module exactly)
# --------------------------------------------------------------------------- #
def attn_block_ref(x, params):
    B, C, H, W = x.shape
    G = NUM_GROUPS
    xg = x.reshape(B, G, C // G, H, W)
    mean = xg.mean(axis=(2, 3, 4), keepdims=True)
    var = xg.var(axis=(2, 3, 4), keepdims=True)
    h = (xg - mean) / jnp.sqrt(var + EPS)
    h = h.reshape(B, C, H, W)
    h = h * params["gamma"][None, :, None, None] + params["beta"][None, :, None, None]

    conv1x1 = lambda w, b, t: jnp.einsum("oc,bchw->bohw", w, t) + b[None, :, None, None]
    q = conv1x1(params["wq"], params["bq"], h)
    k = conv1x1(params["wk"], params["bk"], h)
    v = conv1x1(params["wv"], params["bv"], h)

    q = q.reshape(B, C, H * W).transpose(0, 2, 1)        # (B, HW, C)
    k = k.reshape(B, C, H * W)                           # (B, C, HW)
    w_ = jnp.einsum("bqc,bck->bqk", q, k) * (C ** -0.5)
    w_ = jax.nn.softmax(w_, axis=2)
    v = v.reshape(B, C, H * W).transpose(0, 2, 1)        # (B, HW, C)
    h_ = jnp.einsum("bqk,bkc->bqc", w_, v)
    h_ = h_.transpose(0, 2, 1).reshape(B, C, H, W)
    h_ = conv1x1(params["wp"], params["bp"], h_)
    return x + h_


def make_params(key, C):
    ks = jax.random.split(key, 10)
    s = 1.0 / math.sqrt(C)
    return {
        "gamma": 1.0 + 0.1 * jax.random.normal(ks[0], (C,), jnp.float32),
        "beta": 0.1 * jax.random.normal(ks[1], (C,), jnp.float32),
        "wq": s * jax.random.normal(ks[2], (C, C), jnp.float32),
        "bq": 0.1 * jax.random.normal(ks[3], (C,), jnp.float32),
        "wk": s * jax.random.normal(ks[4], (C, C), jnp.float32),
        "bk": 0.1 * jax.random.normal(ks[5], (C,), jnp.float32),
        "wv": s * jax.random.normal(ks[6], (C, C), jnp.float32),
        "bv": 0.1 * jax.random.normal(ks[7], (C,), jnp.float32),
        "wp": s * jax.random.normal(ks[8], (C, C), jnp.float32),
        "bp": 0.1 * jax.random.normal(ks[9], (C,), jnp.float32),
    }


if __name__ == "__main__":
    # GroupNorm(32, C) requires C % 32 == 0 -> smallest interesting C is 64.
    # Second config exercises multi-tile attention (n_qt > 1) and the chunked
    # qkv loop (HW = 1024 -> two 512-row chunks), with B = 1.
    key = jax.random.PRNGKey(0)
    for (B, C, H, W) in [(2, 64, 16, 16), (1, 64, 32, 32)]:
        key, kx, kp = jax.random.split(key, 3)
        x = jax.random.normal(kx, (B, C, H, W), jnp.float32)
        params = make_params(kp, C)

        out = jax.block_until_ready(attn_block_pallas(x, params))
        ref = attn_block_ref(x, params)
        np.testing.assert_allclose(np.asarray(out), np.asarray(ref),
                                   rtol=2e-2, atol=2e-2)

    print("KERNEL_OK")
</pallas_src>

<mosaic_0001>
module attributes {stable_mosaic.version = 11 : i64} {
  func.func @gn_qkv_kernel(%arg0: i32, %arg1: memref<1x256x64xf32, #tpu.memory_space<vmem>>, %arg2: memref<1x64xf32, #tpu.memory_space<vmem>>, %arg3: memref<1x64xf32, #tpu.memory_space<vmem>>, %arg4: memref<64x32xf32, #tpu.memory_space<vmem>>, %arg5: memref<32x64xf32, #tpu.memory_space<vmem>>, %arg6: memref<64x64xbf16, #tpu.memory_space<vmem>>, %arg7: memref<1x64xf32, #tpu.memory_space<vmem>>, %arg8: memref<64x64xbf16, #tpu.memory_space<vmem>>, %arg9: memref<1x64xf32, #tpu.memory_space<vmem>>, %arg10: memref<64x64xbf16, #tpu.memory_space<vmem>>, %arg11: memref<1x64xf32, #tpu.memory_space<vmem>>, %arg12: memref<1x256x64xbf16, #tpu.memory_space<vmem>>, %arg13: memref<1x64x256xbf16, #tpu.memory_space<vmem>>, %arg14: memref<1x256x64xbf16, #tpu.memory_space<vmem>>) attributes {dimension_semantics = [#tpu.dimension_semantics<parallel>], iteration_bounds = array<i64: 2>, scalar_prefetch = 0 : i64, scratch_operands = 0 : i64, tpu.core_type = #tpu.core_type<tc>, window_params = [{transform_indices = @transform_0, window_bounds = array<i64: 1, 256, 64>}, {pipeline_mode = #tpu.pipeline_mode<synchronous>, transform_indices = @transform_1, window_bounds = array<i64: 1, 64>}, {pipeline_mode = #tpu.pipeline_mode<synchronous>, transform_indices = @transform_2, window_bounds = array<i64: 1, 64>}, {pipeline_mode = #tpu.pipeline_mode<synchronous>, transform_indices = @transform_3, window_bounds = array<i64: 64, 32>}, {pipeline_mode = #tpu.pipeline_mode<synchronous>, transform_indices = @transform_4, window_bounds = array<i64: 32, 64>}, {pipeline_mode = #tpu.pipeline_mode<synchronous>, transform_indices = @transform_5, window_bounds = array<i64: 64, 64>}, {pipeline_mode = #tpu.pipeline_mode<synchronous>, transform_indices = @transform_6, window_bounds = array<i64: 1, 64>}, {pipeline_mode = #tpu.pipeline_mode<synchronous>, transform_indices = @transform_7, window_bounds = array<i64: 64, 64>}, {pipeline_mode = #tpu.pipeline_mode<synchronous>, transform_indices = @transform_8, window_bounds = array<i64: 1, 64>}, {pipeline_mode = #tpu.pipeline_mode<synchronous>, transform_indices = @transform_9, window_bounds = array<i64: 64, 64>}, {pipeline_mode = #tpu.pipeline_mode<synchronous>, transform_indices = @transform_10, window_bounds = array<i64: 1, 64>}, {transform_indices = @transform_11, window_bounds = array<i64: 1, 256, 64>}, {transform_indices = @transform_12, window_bounds = array<i64: 1, 64, 256>}, {transform_indices = @transform_13, window_bounds = array<i64: 1, 256, 64>}]} {
    %c0 = arith.constant 0 : index
    %c0_0 = arith.constant 0 : index
    %c0_1 = arith.constant 0 : index
    %0 = vector.load %arg1[%c0, %c0_0, %c0_1] : memref<1x256x64xf32, #tpu.memory_space<vmem>>, vector<1x256x64xf32>
    %1 = vector.shape_cast %0 : vector<1x256x64xf32> to vector<256x64xf32>
    %cst = arith.constant dense<0.000000e+00> : vector<64xf32>
    %2 = vector.multi_reduction <add>, %1, %cst [0] : vector<256x64xf32> to vector<64xf32>
    %3 = vector.shape_cast %2 : vector<64xf32> to vector<1x64xf32>
    %c0_2 = arith.constant 0 : index
    %c0_3 = arith.constant 0 : index
    %4 = vector.load %arg4[%c0_2, %c0_3] : memref<64x32xf32, #tpu.memory_space<vmem>>, vector<64x32xf32>
    %cst_4 = arith.constant dense<0.000000e+00> : vector<1x32xf32>
    %5 = tpu.matmul %3, %4, %cst_4 {dimension_numbers = #tpu.dot_dimension_numbers<[1], [0], [0], [1], [0, 0, 1, 1], [], []>} : vector<1x64xf32>, vector<64x32xf32>, vector<1x32xf32> -> vector<1x32xf32>
    %cst_5 = arith.constant 5.120000e+02 : f32
    %6 = vector.broadcast %cst_5 : f32 to vector<1x32xf32>
    %7 = arith.divf %5, %6 : vector<1x32xf32>
    %c0_6 = arith.constant 0 : index
    %c0_7 = arith.constant 0 : index
    %8 = vector.load %arg5[%c0_6, %c0_7] : memref<32x64xf32, #tpu.memory_space<vmem>>, vector<32x64xf32>
    %cst_8 = arith.constant dense<0.000000e+00> : vector<1x64xf32>
    %9 = tpu.matmul %7, %8, %cst_8 {dimension_numbers = #tpu.dot_dimension_numbers<[1], [0], [0], [1], [0, 0, 1, 1], [], []>} : vector<1x32xf32>, vector<32x64xf32>, vector<1x64xf32> -> vector<1x64xf32>
    %cst_9 = arith.constant 0.000000e+00 : f32
    %10 = vector.broadcast %cst_9 : f32 to vector<1x64xf32>
    %c0_i32 = arith.constant 0 : i32
    %c256_i32 = arith.constant 256 : i32
    %11 = arith.muli %c0_i32, %c256_i32 : i32
    %12 = tpu.assume_multiple %11, 256 : i32
    %c0_10 = arith.constant 0 : index
    %13 = arith.index_cast %12 : i32 to index
    %c0_11 = arith.constant 0 : index
    %14 = vector.load %arg1[%c0_10, %13, %c0_11] : memref<1x256x64xf32, #tpu.memory_space<vmem>>, vector<1x256x64xf32>
    %15 = vector.shape_cast %14 : vector<1x256x64xf32> to vector<256x64xf32>
    %16 = vector.broadcast %9 : vector<1x64xf32> to vector<256x64xf32>
    %17 = arith.subf %15, %16 : vector<256x64xf32>
    %18 = arith.mulf %17, %17 : vector<256x64xf32>
    %cst_12 = arith.constant dense<0.000000e+00> : vector<64xf32>
    %19 = vector.multi_reduction <add>, %18, %cst_12 [0] : vector<256x64xf32> to vector<64xf32>
    %20 = vector.shape_cast %19 : vector<64xf32> to vector<1x64xf32>
    %21 = arith.addf %10, %20 : vector<1x64xf32>
    %c1_i32 = arith.constant 1 : i32
    %c0_13 = arith.constant 0 : index
    %c0_14 = arith.constant 0 : index
    %22 = vector.load %arg4[%c0_13, %c0_14] : memref<64x32xf32, #tpu.memory_space<vmem>>, vector<64x32xf32>
    %cst_15 = arith.constant dense<0.000000e+00> : vector<1x32xf32>
    %23 = tpu.matmul %21, %22, %cst_15 {dimension_numbers = #tpu.dot_dimension_numbers<[1], [0], [0], [1], [0, 0, 1, 1], [], []>} : vector<1x64xf32>, vector<64x32xf32>, vector<1x32xf32> -> vector<1x32xf32>
    %cst_16 = arith.constant 5.120000e+02 : f32
    %24 = vector.broadcast %cst_16 : f32 to vector<1x32xf32>
    %25 = arith.divf %23, %24 : vector<1x32xf32>
    %c0_17 = arith.constant 0 : index
    %c0_18 = arith.constant 0 : index
    %26 = vector.load %arg5[%c0_17, %c0_18] : memref<32x64xf32, #tpu.memory_space<vmem>>, vector<32x64xf32>
    %cst_19 = arith.constant dense<0.000000e+00> : vector<1x64xf32>
    %27 = tpu.matmul %25, %26, %cst_19 {dimension_numbers = #tpu.dot_dimension_numbers<[1], [0], [0], [1], [0, 0, 1, 1], [], []>} : vector<1x32xf32>, vector<32x64xf32>, vector<1x64xf32> -> vector<1x64xf32>
    %cst_20 = arith.constant 9.99999974E-6 : f32
    %28 = vector.broadcast %cst_20 : f32 to vector<1x64xf32>
    %29 = arith.addf %27, %28 : vector<1x64xf32>
    %30 = math.rsqrt %29 : vector<1x64xf32>
    %c0_21 = arith.constant 0 : index
    %c0_22 = arith.constant 0 : index
    %31 = vector.load %arg2[%c0_21, %c0_22] : memref<1x64xf32, #tpu.memory_space<vmem>>, vector<1x64xf32>
    %32 = arith.mulf %30, %31 : vector<1x64xf32>
    %c0_23 = arith.constant 0 : index
    %c0_24 = arith.constant 0 : index
    %33 = vector.load %arg3[%c0_23, %c0_24] : memref<1x64xf32, #tpu.memory_space<vmem>>, vector<1x64xf32>
    %c0_i32_25 = arith.constant 0 : i32
    %c256_i32_26 = arith.constant 256 : i32
    %34 = arith.muli %c0_i32_25, %c256_i32_26 : i32
    %35 = tpu.assume_multiple %34, 256 : i32
    %c0_27 = arith.constant 0 : index
    %36 = arith.index_cast %35 : i32 to index
    %c0_28 = arith.constant 0 : index
    %37 = vector.load %arg1[%c0_27, %36, %c0_28] : memref<1x256x64xf32, #tpu.memory_space<vmem>>, vector<1x256x64xf32>
    %38 = vector.shape_cast %37 : vector<1x256x64xf32> to vector<256x64xf32>
    %39 = vector.broadcast %9 : vector<1x64xf32> to vector<256x64xf32>
    %40 = arith.subf %38, %39 : vector<256x64xf32>
    %41 = vector.broadcast %32 : vector<1x64xf32> to vector<256x64xf32>
    %42 = arith.mulf %40, %41 : vector<256x64xf32>
    %43 = vector.broadcast %33 : vector<1x64xf32> to vector<256x64xf32>
    %44 = arith.addf %42, %43 : vector<256x64xf32>
    %45 = arith.truncf %44 : vector<256x64xf32> to vector<256x64xbf16>
    %c0_29 = arith.constant 0 : index
    %c0_30 = arith.constant 0 : index
    %46 = vector.load %arg6[%c0_29, %c0_30] : memref<64x64xbf16, #tpu.memory_space<vmem>>, vector<64x64xbf16>
    %cst_31 = arith.constant dense<0.000000e+00> : vector<256x64xf32>
    %47 = tpu.matmul %45, %46, %cst_31 {dimension_numbers = #tpu.dot_dimension_numbers<[1], [0], [0], [1], [0, 0, 1, 1], [], []>} : vector<256x64xbf16>, vector<64x64xbf16>, vector<256x64xf32> -> vector<256x64xf32>
    %c0_32 = arith.constant 0 : index
    %c0_33 = arith.constant 0 : index
    %48 = vector.load %arg7[%c0_32, %c0_33] : memref<1x64xf32, #tpu.memory_space<vmem>>, vector<1x64xf32>
    %49 = vector.broadcast %48 : vector<1x64xf32> to vector<256x64xf32>
    %50 = arith.addf %47, %49 : vector<256x64xf32>
    %51 = arith.truncf %50 : vector<256x64xf32> to vector<256x64xbf16>
    %c0_34 = arith.constant 0 : index
    %52 = arith.index_cast %35 : i32 to index
    %c0_35 = arith.constant 0 : index
    %53 = vector.load %arg12[%c0_34, %52, %c0_35] : memref<1x256x64xbf16, #tpu.memory_space<vmem>>, vector<1x256x64xbf16>
    %54 = vector.shape_cast %53 : vector<1x256x64xbf16> to vector<256x64xbf16>
    %55 = vector.shape_cast %51 : vector<256x64xbf16> to vector<1x256x64xbf16>
    tpu.vector_store %arg12[%c0_34, %52, %c0_35], %55 {strides = array<i32>} : memref<1x256x64xbf16, #tpu.memory_space<vmem>>, vector<1x256x64xbf16>,
    %c0_36 = arith.constant 0 : index
    %c0_37 = arith.constant 0 : index
    %56 = vector.load %arg8[%c0_36, %c0_37] : memref<64x64xbf16, #tpu.memory_space<vmem>>, vector<64x64xbf16>
    %cst_38 = arith.constant dense<0.000000e+00> : vector<256x64xf32>
    %57 = tpu.matmul %45, %56, %cst_38 {dimension_numbers = #tpu.dot_dimension_numbers<[1], [0], [0], [1], [0, 0, 1, 1], [], []>} : vector<256x64xbf16>, vector<64x64xbf16>, vector<256x64xf32> -> vector<256x64xf32>
    %c0_39 = arith.constant 0 : index
    %c0_40 = arith.constant 0 : index
    %58 = vector.load %arg9[%c0_39, %c0_40] : memref<1x64xf32, #tpu.memory_space<vmem>>, vector<1x64xf32>
    %59 = vector.broadcast %58 : vector<1x64xf32> to vector<256x64xf32>
    %60 = arith.addf %57, %59 : vector<256x64xf32>
    %61 = tpu.transpose %60, [1, 0] : vector<256x64xf32> -> vector<64x256xf32>
    %62 = arith.truncf %61 : vector<64x256xf32> to vector<64x256xbf16>
    %c0_41 = arith.constant 0 : index
    %c0_42 = arith.constant 0 : index
    %63 = arith.index_cast %35 : i32 to index
    %64 = vector.load %arg13[%c0_41, %c0_42, %63] : memref<1x64x256xbf16, #tpu.memory_space<vmem>>, vector<1x64x256xbf16>
    %65 = vector.shape_cast %64 : vector<1x64x256xbf16> to vector<64x256xbf16>
    %66 = vector.shape_cast %62 : vector<64x256xbf16> to vector<1x64x256xbf16>
    tpu.vector_store %arg13[%c0_41, %c0_42, %63], %66 {strides = array<i32>} : memref<1x64x256xbf16, #tpu.memory_space<vmem>>, vector<1x64x256xbf16>,
    %c0_43 = arith.constant 0 : index
    %c0_44 = arith.constant 0 : index
    %67 = vector.load %arg10[%c0_43, %c0_44] : memref<64x64xbf16, #tpu.memory_space<vmem>>, vector<64x64xbf16>
    %cst_45 = arith.constant dense<0.000000e+00> : vector<256x64xf32>
    %68 = tpu.matmul %45, %67, %cst_45 {dimension_numbers = #tpu.dot_dimension_numbers<[1], [0], [0], [1], [0, 0, 1, 1], [], []>} : vector<256x64xbf16>, vector<64x64xbf16>, vector<256x64xf32> -> vector<256x64xf32>
    %c0_46 = arith.constant 0 : index
    %c0_47 = arith.constant 0 : index
    %69 = vector.load %arg11[%c0_46, %c0_47] : memref<1x64xf32, #tpu.memory_space<vmem>>, vector<1x64xf32>
    %70 = vector.broadcast %69 : vector<1x64xf32> to vector<256x64xf32>
    %71 = arith.addf %68, %70 : vector<256x64xf32>
    %72 = arith.truncf %71 : vector<256x64xf32> to vector<256x64xbf16>
    %c0_48 = arith.constant 0 : index
    %73 = arith.index_cast %35 : i32 to index
    %c0_49 = arith.constant 0 : index
    %74 = vector.load %arg14[%c0_48, %73, %c0_49] : memref<1x256x64xbf16, #tpu.memory_space<vmem>>, vector<1x256x64xbf16>
    %75 = vector.shape_cast %74 : vector<1x256x64xbf16> to vector<256x64xbf16>
    %76 = vector.shape_cast %72 : vector<256x64xbf16> to vector<1x256x64xbf16>
    tpu.vector_store %arg14[%c0_48, %73, %c0_49], %76 {strides = array<i32>} : memref<1x256x64xbf16, #tpu.memory_space<vmem>>, vector<1x256x64xbf16>,
    %c1_i32_50 = arith.constant 1 : i32
    return
  }
  func.func @transform_0(%arg0: i32) -> (i32, i32, i32) {
    %c0_i32 = arith.constant 0 : i32
    %c0_i32_0 = arith.constant 0 : i32
    %c0_i32_1 = arith.constant 0 : i32
    return %arg0, %c0_i32, %c0_i32_0 : i32, i32, i32
  }
  func.func @transform_1(%arg0: i32) -> (i32, i32) {
    %c0_i32 = arith.constant 0 : i32
    %c0_i32_0 = arith.constant 0 : i32
    %c0_i32_1 = arith.constant 0 : i32
    return %c0_i32, %c0_i32_0 : i32, i32
  }
  func.func @transform_2(%arg0: i32) -> (i32, i32) {
    %c0_i32 = arith.constant 0 : i32
    %c0_i32_0 = arith.constant 0 : i32
    %c0_i32_1 = arith.constant 0 : i32
    return %c0_i32, %c0_i32_0 : i32, i32
  }
  func.func @transform_3(%arg0: i32) -> (i32, i32) {
    %c0_i32 = arith.constant 0 : i32
    %c0_i32_0 = arith.constant 0 : i32
    %c0_i32_1 = arith.constant 0 : i32
    return %c0_i32, %c0_i32_0 : i32, i32
  }
  func.func @transform_4(%arg0: i32) -> (i32, i32) {
    %c0_i32 = arith.constant 0 : i32
    %c0_i32_0 = arith.constant 0 : i32
    %c0_i32_1 = arith.constant 0 : i32
    return %c0_i32, %c0_i32_0 : i32, i32
  }
  func.func @transform_5(%arg0: i32) -> (i32, i32) {
    %c0_i32 = arith.constant 0 : i32
    %c0_i32_0 = arith.constant 0 : i32
    %c0_i32_1 = arith.constant 0 : i32
    return %c0_i32, %c0_i32_0 : i32, i32
  }
  func.func @transform_6(%arg0: i32) -> (i32, i32) {
    %c0_i32 = arith.constant 0 : i32
    %c0_i32_0 = arith.constant 0 : i32
    %c0_i32_1 = arith.constant 0 : i32
    return %c0_i32, %c0_i32_0 : i32, i32
  }
  func.func @transform_7(%arg0: i32) -> (i32, i32) {
    %c0_i32 = arith.constant 0 : i32
    %c0_i32_0 = arith.constant 0 : i32
    %c0_i32_1 = arith.constant 0 : i32
    return %c0_i32, %c0_i32_0 : i32, i32
  }
  func.func @transform_8(%arg0: i32) -> (i32, i32) {
    %c0_i32 = arith.constant 0 : i32
    %c0_i32_0 = arith.constant 0 : i32
    %c0_i32_1 = arith.constant 0 : i32
    return %c0_i32, %c0_i32_0 : i32, i32
  }
  func.func @transform_9(%arg0: i32) -> (i32, i32) {
    %c0_i32 = arith.constant 0 : i32
    %c0_i32_0 = arith.constant 0 : i32
    %c0_i32_1 = arith.constant 0 : i32
    return %c0_i32, %c0_i32_0 : i32, i32
  }
  func.func @transform_10(%arg0: i32) -> (i32, i32) {
    %c0_i32 = arith.constant 0 : i32
    %c0_i32_0 = arith.constant 0 : i32
    %c0_i32_1 = arith.constant 0 : i32
    return %c0_i32, %c0_i32_0 : i32, i32
  }
  func.func @transform_11(%arg0: i32) -> (i32, i32, i32) {
    %c0_i32 = arith.constant 0 : i32
    %c0_i32_0 = arith.constant 0 : i32
    %c0_i32_1 = arith.constant 0 : i32
    return %arg0, %c0_i32, %c0_i32_0 : i32, i32, i32
  }
  func.func @transform_12(%arg0: i32) -> (i32, i32, i32) {
    %c0_i32 = arith.constant 0 : i32
    %c0_i32_0 = arith.constant 0 : i32
    %c0_i32_1 = arith.constant 0 : i32
    return %arg0, %c0_i32, %c0_i32_0 : i32, i32, i32
  }
  func.func @transform_13(%arg0: i32) -> (i32, i32, i32) {
    %c0_i32 = arith.constant 0 : i32
    %c0_i32_0 = arith.constant 0 : i32
    %c0_i32_1 = arith.constant 0 : i32
    return %arg0, %c0_i32, %c0_i32_0 : i32, i32, i32
  }
}

</mosaic_0001>

<bundles_post_ra>
// kernel: tpu_custom_call.1
= control target key start
LH: loop header
LB: loop body
LE: loop exit
PB: predicated region body
PF: predicated region fallthrough
CT: control target
= control target key end

     0   :  { %s4312_s0 = inlined_call_operand.vmem [shape: f32[2,256,64], index: 0, kind: input, shape index: {}]   ;;  %s4313_s1 = inlined_call_operand.vmem [shape: f32[1,64], index: 1, kind: input, shape index: {}]   ;;  %s4314_s2 = inlined_call_operand.vmem [shape: f32[1,64], index: 2, kind: input, shape index: {}]   ;;  %s4315_s3 = inlined_call_operand.vmem [shape: f32[64,32], index: 3, kind: input, shape index: {}]   ;;  %s4316_s4 = inlined_call_operand.vmem [shape: f32[32,64], index: 4, kind: input, shape index: {}]   ;;  %s4317_s5 = inlined_call_operand.vmem [shape: bf16[64,64], index: 5, kind: input, shape index: {}]   ;;  %s4318_s6 = inlined_call_operand.vmem [shape: f32[1,64], index: 6, kind: input, shape index: {}]   ;;  %s4319_s7 = inlined_call_operand.vmem [shape: bf16[64,64], index: 7, kind: input, shape index: {}]   ;;  %s4320_s8 = inlined_call_operand.vmem [shape: f32[1,64], index: 8, kind: input, shape index: {}]   ;;  %s4321_s9 = inlined_call_operand.vmem [shape: bf16[64,64], index: 9, kind: input, shape index: {}]   ;;  %s4322_s10 = inlined_call_operand.vmem [shape: f32[1,64], index: 10, kind: input, shape index: {}]   ;;  %s4323_s11 = inlined_call_operand.vmem [shape: bf16[2,256,64], index: 11, kind: output, shape index: {0}]   ;;  %s4324_s12 = inlined_call_operand.hbm [shape: bf16[2,64,256], index: 12, kind: output, shape index: {1}]   ;;  %s4325_s13 = inlined_call_operand.vmem [shape: bf16[2,256,64], index: 13, kind: output, shape index: {2}]  }
   0x1   :  { %4326 = sst [smem:[#allocation5_spill]] %s4312_s0 }
   0x2   :  { %4327 = sst [smem:[#allocation6_spill]] %s4313_s1 }
   0x3   :  { %4328 = sst [smem:[#allocation7_spill]] %s4314_s2 }
   0x4   :  { %19 = vsyncpa [#allocation3], 0 }
   0x5   :  { %21 = vsyncpa [#allocation3 + $0x1], 0  ;;  %s3144_s25 = smov 0   ;;  %s3146_s26 = smov 0  }
   0x6   :  { %s3148_s27 = smov 0   ;;  %s3150_s28 = smov 0  }
   0x7 LB: > { %s3165_s29 = sadd.s32 4294967295, %s3067_s28   ;;  %s2370_s30 = sadd.s32 4294967294, %s3067_s28   ;;  %s3067_s28 = sphi %s3150_s28, %s4337_s28   ;;  %s3063_s27 = sphi %s3148_s27, %s4336_s27   ;;  %s3059_s26 = sphi %s3146_s26, %s4335_s26   ;;  %s3055_s25 = sphi %s3144_s25, %s4334_s25  }
   0x8   : > { %s3169_s14 = sadd.s32 1, %s3067_s28   ;;  %s296_s15 = sadd.s32 1, %s3063_s27 }
   0x9   : > { %s293_s16 = ssub.s32 %s3067_s28, %s3169_s14  ;;  %p306_p0 = scmp.ne.s32.totalorder %s3063_s27, %s3059_s26 }
   0xa   : > { %p294_p1 = scmp.eq.s32.totalorder %s293_s16, 0  ;;  %p307_p2 = scmp.eq.s32.totalorder %s3165_s29, 1 }
   0xb   : > { %p312_p3 = scmp.ne.s32.totalorder %s3059_s26, %s3055_s25  ;;  %p313_p4 = scmp.eq.s32.totalorder %s2370_s30, 1 }
   0xc   : > { %s3180_s17 = scalar_select %p294_p1, %s3063_s27, %s296_s15  }
   0xd   : > { %p3182_p5 = por %p307_p2, %p306_p0  ;;  %p3186_p6 = por %p313_p4, %p312_p3 }
   0xe   : > { %p2373_p7 = scmp.ge.s32.totalorder %s3067_s28, 1  ;;  %p395_p8 = scmp.lt.s32.totalorder %s3067_s28, 3 }
  0x10   : > { %p396_p9 = pnand %p2373_p7, %p395_p8 }
  0x11   : > { %p449_p10 = scmp.lt.s32.totalorder (!%p396_p9), %s3165_s29, 1  ;;  %s4331_s0 = sld [smem:[#allocation5_spill]] (!%p396_p9) }
  0x12   : > { %399 = sbr.rel (%p396_p9) target bundleno = 1421 (0x58d), region = 64  ;;  %s4332_s1 = sld [smem:[#allocation6_spill]] (!%p396_p9) }
  0x13   : > { %s4333_s2 = sld [smem:[#allocation7_spill]] (!%p396_p9)  ;;  %s2601_s22 = sshll.u32 (!%p396_p9), %s3165_s29, 10 }
  0x17   : > { %v3195_v0 = vld [vmem:[%s4315_s3 + $0x38] sm:$0xff]  ;;  %v3069_v1 = vmov 0.0   ;;  %v3202_v2 = vld [vmem:[%s4315_s3 + $0x30] sm:$0xff]  ;;  %vm3070_vm0 = vmmov 0   ;;  %v3210_v3 = vld [vmem:[%s4315_s3 + $0x28] sm:$0xff]  ;;  %s3213_s15 = scalar_select %p449_p10, %s3165_s29, 1 }
  0x18   : > { %2690 = vmatprep.subr.mxu0 %v3069_v1  ;;  %2706 = vmatprep.mubr.msk.f32.mxu0 %vm3070_vm0, %v3069_v1  ;;  %v3219_v4 = vld [vmem:[%s4316_s4 + $0x18] sm:$0xff]  ;;  %v3225_v5 = vld [vmem:[%s4315_s3 + $0x20] sm:$0xff]  ;;  %v3231_v6 = vld [vmem:[%s4316_s4 + $0x10] sm:$0xff]  ;;  %vm497_vm1 = vcmask 523264   ;;  %vm654_vm2 = vcmask 261120   ;;  %vm1515_vm3 = vcmask 519168  }
  0x19   : > { %2691 = vmatpush3.msra.mxu0 %v3195_v0  ;;  %2709 = vmatprep.subr.mxu1 %v3069_v1  ;;  %s2526_s30 = sshll.u32 %s3213_s15, 8  ;;  %v3258_v10 = vld [vmem:[%s4315_s3 + $0x18] sm:$0xff]  ;;  %v3279_v17 = vld [vmem:[%s4315_s3 + $0x10] sm:$0xff]  ;;  %v3291_v21 = vld [vmem:[%s4315_s3 + $0x8] sm:$0xff]  ;;  %s2527_s23 = sshll.u32 %s3213_s15, 7 }
  0x1a   : > { %2692 = vmatprep.subr.mxu0 %v3069_v1  ;;  %2710 = vmatpush3.msra.mxu1 %v3219_v4  ;;  %s3240_s21 = scalar_lea.vmem %s4331_s0, %s2526_s30  ;;  %v3303_v25 = vld [vmem:[%s4315_s3] sm:$0xff]  ;;  %s3959_s30 = scalar_lea.vmem %s4323_s11, %s2527_s23 }
  0x1b   : > { %2693 = vmatpush3.msra.mxu0 %v3202_v2  ;;  %2711 = vmatprep.subr.mxu1 %v3069_v1  ;;  %v3245_v7 = vld [vmem:[%s3240_s21] sm:$0xff]  ;;  %v3248_v8 = vld [vmem:[%s3240_s21 + $0x8] sm:$0xff]  ;;  %v3251_v9 = vld [vmem:[%s3240_s21 + $0x10] sm:$0xff]  ;;  %s4064_s24 = scalar_lea.vmem %s4325_s13, %s2527_s23  ;;  %s4265_s23 = scalar_lea.hbm %s4324_s12, %s2601_s22 }
  0x1c   : > { %2694 = vmatprep.subr.mxu0 %v3069_v1  ;;  %2712 = vmatpush3.msra.mxu1 %v3231_v6  ;;  %v3261_v11 = vld [vmem:[%s3240_s21 + $0x18] sm:$0xff]  ;;  %v498_v12 = vsel %vm497_vm1, %v3245_v7, 0.0  ;;  %v499_v13 = vsel %vm497_vm1, %v3248_v8, 0.0  ;;  %v501_v14 = vsel %vm497_vm1, %v3251_v9, 0.0  ;;  %v3273_v15 = vld [vmem:[%s3240_s21 + $0x20] sm:$0xff]  ;;  %v3285_v19 = vld [vmem:[%s3240_s21 + $0x28] sm:$0xff] }
  0x1d   : > { %2695 = vmatpush3.msra.mxu0 %v3210_v3  ;;  %2713 = vmatprep.subr.mxu1 %v3069_v1  ;;  %v500_v16 = vadd.f32 %v499_v13, %v498_v12  ;;  %v503_v18 = vsel %vm497_vm1, %v3261_v11, 0.0  ;;  %v505_v22 = vsel %vm497_vm1, %v3273_v15, 0.0  ;;  %v3297_v23 = vld [vmem:[%s3240_s21 + $0x30] sm:$0xff]  ;;  %v3306_v26 = vld [vmem:[%s3240_s21 + $0x38] sm:$0xff]  ;;  %v507_v27 = vsel %vm497_vm1, %v3285_v19, 0.0  ;;  %v3312_v28 = vld [vmem:[%s3240_s21 + $0x40] sm:$0xff] }
  0x1e   : > { %2696 = vmatprep.subr.mxu0 %v3069_v1  ;;  %2717 = vmatprep.mubr.msk.f32.mxu1 %vm3070_vm0, %v3069_v1  ;;  %v3315_v29 = vld [vmem:[%s3240_s21 + $0x48] sm:$0xff]  ;;  %v509_v31 = vsel %vm497_vm1, %v3297_v23, 0.0  ;;  %v511_v33 = vsel %vm497_vm1, %v3306_v26, 0.0  ;;  %v513_v34 = vsel %vm497_vm1, %v3312_v28, 0.0  ;;  %v3329_v36 = vld [vmem:[%s3240_s21 + $0x50] sm:$0xff]  ;;  %v3332_v38 = vld [vmem:[%s3240_s21 + $0x58] sm:$0xff] }
  0x1f   : > { %2697 = vmatpush3.msra.mxu0 %v3225_v5  ;;  %v502_v20 = vadd.f32 %v501_v14, %v500_v16  ;;  %v515_v35 = vsel %vm497_vm1, %v3315_v29, 0.0  ;;  %v517_v41 = vsel %vm497_vm1, %v3329_v36, 0.0  ;;  %v3337_v42 = vld [vmem:[%s3240_s21 + $0x60] sm:$0xff]  ;;  %v519_v44 = vsel %vm497_vm1, %v3332_v38, 0.0  ;;  %v3342_v45 = vld [vmem:[%s3240_s21 + $0x68] sm:$0xff]  ;;  %v3347_v48 = vld [vmem:[%s3240_s21 + $0x70] sm:$0xff] }
  0x20   : > { %2698 = vmatprep.subr.mxu0 %v3069_v1  ;;  %v521_v47 = vsel %vm497_vm1, %v3337_v42, 0.0  ;;  %v523_v50 = vsel %vm497_vm1, %v3342_v45, 0.0  ;;  %v3352_v51 = vld [vmem:[%s3240_s21 + $0x78] sm:$0xff]  ;;  %v525_v53 = vsel %vm497_vm1, %v3347_v48, 0.0  ;;  %v3357_v54 = vld [vmem:[%s3240_s21 + $0x80] sm:$0xff]  ;;  %v3362_v57 = vld [vmem:[%s3240_s21 + $0x88] sm:$0xff] }
  0x21   : > { %2699 = vmatpush3.msra.mxu0 %v3258_v10  ;;  %v504_v24 = vadd.f32 %v503_v18, %v502_v20  ;;  %v527_v56 = vsel %vm497_vm1, %v3352_v51, 0.0  ;;  %v529_v59 = vsel %vm497_vm1, %v3357_v54, 0.0  ;;  %v3367_v60 = vld [vmem:[%s3240_s21 + $0x90] sm:$0xff]  ;;  %v531_v62 = vsel %vm497_vm1, %v3362_v57, 0.0  ;;  %v3372_v63 = vld [vmem:[%s3240_s21 + $0x98] sm:$0xff]  ;;  %v3377_v14 = vld [vmem:[%s3240_s21 + $0xa0] sm:$0xff] }
  0x22   : > { %2700 = vmatprep.subr.mxu0 %v3069_v1  ;;  %v533_v13 = vsel %vm497_vm1, %v3367_v60, 0.0  ;;  %v535_v18 = vsel %vm497_vm1, %v3372_v63, 0.0  ;;  %v3382_v20 = vld [vmem:[%s3240_s21 + $0xa8] sm:$0xff]  ;;  %s3071_s0 = smov [#allocation2]  }
  0x23   : > { %2701 = vmatpush3.msra.mxu0 %v3279_v17  ;;  %v506_v30 = vadd.f32 %v505_v22, %v504_v24  ;;  %v537_v24 = vsel %vm497_vm1, %v3377_v14, 0.0 }
  0x24   : > { %2702 = vmatprep.subr.mxu0 %v3069_v1 }
  0x25   : > { %2703 = vmatpush3.msra.mxu0 %v3291_v21  ;;  %v508_v32 = vadd.f32 %v507_v27, %v506_v30  ;;  %v3387_v27 = vld [vmem:[%s3240_s21 + $0xb0] sm:$0xff] }
  0x26   : > { %2704 = vmatprep.subr.mxu0 %v3069_v1 }
  0x27   : > { %2705 = vmatpush3.msra.mxu0 %v3303_v25  ;;  %v510_v37 = vadd.f32 %v509_v31, %v508_v32  ;;  %v539_v31 = vsel %vm497_vm1, %v3382_v20, 0.0  ;;  %v3392_v32 = vld [vmem:[%s3240_s21 + $0xb8] sm:$0xff] }
  0x28   : > { %2739 = vmatprep.subr.mxu0 %v3069_v1 }
  0x29   : > { %v512_v39 = vadd.f32 %v511_v33, %v510_v37 }
  0x2b   : > { %v514_v40 = vadd.f32 %v513_v34, %v512_v39  ;;  %v541_v34 = vsel %vm497_vm1, %v3387_v27, 0.0  ;;  %v543_v39 = vsel %vm497_vm1, %v3392_v32, 0.0 }
  0x2d   : > { %v516_v43 = vadd.f32 %v515_v35, %v514_v40  ;;  %v3397_v35 = vld [vmem:[%s3240_s21 + $0xc0] sm:$0xff]  ;;  %v3402_v40 = vld [vmem:[%s3240_s21 + $0xc8] sm:$0xff] }
  0x2f   : > { %v518_v46 = vadd.f32 %v517_v41, %v516_v43  ;;  %v545_v43 = vsel %vm497_vm1, %v3397_v35, 0.0 }
  0x31   : > { %v520_v49 = vadd.f32 %v519_v44, %v518_v46  ;;  %v3407_v44 = vld [vmem:[%s3240_s21 + $0xd0] sm:$0xff] }
  0x33   : > { %v522_v52 = vadd.f32 %v521_v47, %v520_v49  ;;  %v547_v47 = vsel %vm497_vm1, %v3402_v40, 0.0  ;;  %v3412_v49 = vld [vmem:[%s3240_s21 + $0xd8] sm:$0xff] }
  0x35   : > { %v524_v55 = vadd.f32 %v523_v50, %v522_v52  ;;  %v549_v52 = vsel %vm497_vm1, %v3407_v44, 0.0 }
  0x37   : > { %v526_v58 = vadd.f32 %v525_v53, %v524_v55  ;;  %v3417_v53 = vld [vmem:[%s3240_s21 + $0xe0] sm:$0xff] }
  0x39   : > { %v528_v61 = vadd.f32 %v527_v56, %v526_v58  ;;  %v551_v56 = vsel %vm497_vm1, %v3412_v49, 0.0  ;;  %v3422_v58 = vld [vmem:[%s3240_s21 + $0xe8] sm:$0xff] }
  0x3b   : > { %v530_v12 = vadd.f32 %v529_v59, %v528_v61  ;;  %v553_v61 = vsel %vm497_vm1, %v3417_v53, 0.0 }
  0x3d   : > { %v532_v16 = vadd.f32 %v531_v62, %v530_v12  ;;  %v3427_v62 = vld [vmem:[%s3240_s21 + $0xf0] sm:$0xff] }
  0x3f   : > { %v534_v22 = vadd.f32 %v533_v13, %v532_v16  ;;  %v555_v13 = vsel %vm497_vm1, %v3422_v58, 0.0  ;;  %v3432_v16 = vld [vmem:[%s3240_s21 + $0xf8] sm:$0xff] }
  0x41   : > { %v536_v30 = vadd.f32 %v535_v18, %v534_v22  ;;  %v557_v22 = vsel %vm497_vm1, %v3427_v62, 0.0 }
  0x43   : > { %v538_v33 = vadd.f32 %v537_v24, %v536_v30  ;;  %v559_v30 = vsel %vm497_vm1, %v3432_v16, 0.0 }
  0x45   : > { %v540_v37 = vadd.f32 %v539_v31, %v538_v33 }
  0x47   : > { %v542_v41 = vadd.f32 %v541_v34, %v540_v37 }
  0x49   : > { %v544_v46 = vadd.f32 %v543_v39, %v542_v41 }
  0x4b   : > { %v546_v50 = vadd.f32 %v545_v43, %v544_v46 }
  0x4d   : > { %v548_v55 = vadd.f32 %v547_v47, %v546_v50  ;;  %v651_v47 = vld [vmem:[%s4316_s4 + $0x8] sm:$0xff] }
  0x4e   : > { %2714 = vmatpush3.msra.mxu1 %v651_v47 }
  0x4f   : > { %v550_v59 = vadd.f32 %v549_v52, %v548_v55  ;;  %2715 = vmatprep.subr.mxu1 %v3069_v1 }
  0x51   : > { %v552_v12 = vadd.f32 %v551_v56, %v550_v59 }
  0x53   : > { %v554_v18 = vadd.f32 %v553_v61, %v552_v12 }
  0x55   : > { %v556_v24 = vadd.f32 %v555_v13, %v554_v18 }
  0x57   : > { %v558_v31 = vadd.f32 %v557_v22, %v556_v24 }
  0x59   : > { %v560_v33 = vadd.f32 %v559_v30, %v558_v31 }
  0x5b   : > { %v561_v34 = vrot.slane %v560_v33, 4 }
  0x5d   : > { %v562_v37 = vadd.f32 %v561_v34, %v560_v33 }
  0x5f   : > { %v563_v39 = vrot.slane %v562_v37, 2 }
  0x61   : > { %v564_v41 = vadd.f32 %v563_v39, %v562_v37 }
  0x63   : > { %v565_v43 = vrot.slane %v564_v41, 1 }
  0x65   : > { %v566_v46 = vadd.f32 %v565_v43, %v564_v41 }
  0x67   : > { %2707 = vmatmul.mubr.msk.f32.vlgmr.msra.gmra.mxu0 %vm497_vm1, %v566_v46 }
  0x68   : > { %2740 = vmatpush3.msra.mxu0 %v3219_v4  ;;  %2747 = vmatprep.mubr.msk.f32.mxu0 %vm3070_vm0, %v3069_v1  ;;  %v650_v4 = vld [vmem:[%s4316_s4] sm:$0xff] }
  0x69   : > { %2741 = vmatprep.subr.mxu0 %v3069_v1  ;;  %2716 = vmatpush3.msra.mxu1 %v650_v4 }
  0x6a   : > { %2742 = vmatpush3.msra.mxu0 %v3231_v6  ;;  %2720 = vmatprep.subr.mxu1 %v3069_v1 }
  0x6b   : > { %2743 = vmatprep.subr.mxu0 %v3069_v1 }
  0x6c   : > { %2744 = vmatpush3.msra.mxu0 %v651_v47 }
  0x6d   : > { %2745 = vmatprep.subr.mxu0 %v3069_v1 }
  0x6e   : > { %2746 = vmatpush3.msra.mxu0 %v650_v4 }
 0x127   : > { %v644_v6 = vpop.f32.mrf.mxu0 }
 0x128   : > { %v649_v50 = vmul.f32 0.001953125, %v644_v6 }
 0x129   : > { %v2708_v52 = vpop.f32.mrf.mxu0 }
 0x12a   : > { %2718 = vmatmul.mubr.msk.f32.vlgmr.msra.gmra.mxu1 %vm654_vm2, %v649_v50 }
 0x12b   : > { %2721 = vmatpush3.msra.mxu1 %v3195_v0  ;;  %2736 = vmatprep.mubr.msk.f32.mxu1 %vm3070_vm0, %v3069_v1  ;;  %v760_v0 = vlaneseq }
 0x12c   : > { %2722 = vmatprep.subr.mxu1 %v3069_v1 }
 0x12d   : > { %2723 = vmatpush3.msra.mxu1 %v3202_v2  ;;  %v3472_v2 = vshrl.u32 %v760_v0, 7 }
 0x12e   : > { %2724 = vmatprep.subr.mxu1 %v3069_v1 }
 0x12f   : > { %2725 = vmatpush3.msra.mxu1 %v3210_v3  ;;  %v762_v55 = vsub.s32 0, %v3472_v2 }
 0x130   : > { %2726 = vmatprep.subr.mxu1 %v3069_v1 }
 0x131   : > { %2727 = vmatpush3.msra.mxu1 %v3225_v5 }
 0x132   : > { %2728 = vmatprep.subr.mxu1 %v3069_v1 }
 0x133   : > { %2729 = vmatpush3.msra.mxu1 %v3258_v10 }
 0x134   : > { %2730 = vmatprep.subr.mxu1 %v3069_v1 }
 0x135   : > { %2731 = vmatpush3.msra.mxu1 %v3279_v17 }
 0x136   : > { %2732 = vmatprep.subr.mxu1 %v3069_v1 }
 0x137   : > { %2733 = vmatpush3.msra.mxu1 %v3291_v21 }
 0x138   : > { %2734 = vmatprep.subr.mxu1 %v3069_v1 }
 0x139   : > { %2735 = vmatpush3.msra.mxu1 %v3303_v25 }
 0x1ea   : > { %v724_v3 = vpop.f32.mrf.mxu1 }
 0x1eb   : > { %v3477_v10 = vrot.slane %v724_v3, %v762_v55 }
 0x1ec   : > { %v2719_v5 = vpop.f32.mrf.mxu1 }
 0x1ed   : > { %v3481_v17 = vsub.f32 %v3245_v7, %v3477_v10  ;;  %v3485_v1 = vsub.f32 %v3248_v8, %v3477_v10  ;;  %v3489_v21 = vsub.f32 %v3251_v9, %v3477_v10  ;;  %v3493_v25 = vsub.f32 %v3261_v11, %v3477_v10 }
 0x1ee   : > { %v3501_v7 = vsub.f32 %v3273_v15, %v3477_v10  ;;  %v3507_v9 = vsub.f32 %v3285_v19, %v3477_v10  ;;  %v3515_v18 = vsub.f32 %v3297_v23, %v3477_v10  ;;  %v3522_v19 = vsub.f32 %v3306_v26, %v3477_v10 }
 0x1ef   : > { %v796_v56 = vmul.f32 %v3481_v17, %v3481_v17  ;;  %v797_v59 = vmul.f32 %v3485_v1, %v3485_v1  ;;  %v798_v8 = vmul.f32 %v3489_v21, %v3489_v21  ;;  %v799_v11 = vmul.f32 %v3493_v25, %v3493_v25 }
 0x1f0   : > { %v800_v15 = vmul.f32 %v3501_v7, %v3501_v7  ;;  %v801_v30 = vmul.f32 %v3507_v9, %v3507_v9  ;;  %v3529_v23 = vsub.f32 %v3312_v28, %v3477_v10  ;;  %v802_v34 = vmul.f32 %v3515_v18, %v3515_v18 }
 0x1f1   : > { %v828_v61 = vsel %vm497_vm1, %v796_v56, 0.0  ;;  %v829_v12 = vsel %vm497_vm1, %v797_v59, 0.0  ;;  %v831_v22 = vsel %vm497_vm1, %v798_v8, 0.0  ;;  %v833_v31 = vsel %vm497_vm1, %v799_v11, 0.0 }
 0x1f2   : > { %v830_v13 = vadd.f32 %v829_v12, %v828_v61  ;;  %v835_v37 = vsel %vm497_vm1, %v800_v15, 0.0  ;;  %v3536_v26 = vsub.f32 %v3315_v29, %v3477_v10  ;;  %v803_v41 = vmul.f32 %v3522_v19, %v3522_v19 }
 0x1f3   : > { %v837_v43 = vsel %vm497_vm1, %v801_v30, 0.0  ;;  %v3543_v28 = vsub.f32 %v3329_v36, %v3477_v10  ;;  %v804_v47 = vmul.f32 %v3529_v23, %v3529_v23  ;;  %v839_v4 = vsel %vm497_vm1, %v802_v34, 0.0 }
 0x1f4   : > { %v832_v24 = vadd.f32 %v831_v22, %v830_v13  ;;  %v3550_v29 = vsub.f32 %v3332_v38, %v3477_v10  ;;  %v805_v50 = vmul.f32 %v3536_v26, %v3536_v26  ;;  %v841_v52 = vsel %vm497_vm1, %v803_v41, 0.0 }
 0x1f5   : > { %v3557_v36 = vsub.f32 %v3337_v42, %v3477_v10  ;;  %v806_v3 = vmul.f32 %v3543_v28, %v3543_v28  ;;  %v843_v5 = vsel %vm497_vm1, %v804_v47, 0.0  ;;  %v3564_v38 = vsub.f32 %v3342_v45, %v3477_v10 }
 0x1f6   : > { %v834_v33 = vadd.f32 %v833_v31, %v832_v24  ;;  %v807_v59 = vmul.f32 %v3550_v29, %v3550_v29  ;;  %v845_v8 = vsel %vm497_vm1, %v805_v50, 0.0  ;;  %v3571_v42 = vsub.f32 %v3347_v48, %v3477_v10 }
 0x1f7   : > { %v808_v61 = vmul.f32 %v3557_v36, %v3557_v36  ;;  %v847_v12 = vsel %vm497_vm1, %v806_v3, 0.0  ;;  %v3578_v45 = vsub.f32 %v3352_v51, %v3477_v10  ;;  %v809_v15 = vmul.f32 %v3564_v38, %v3564_v38 }
 0x1f8   : > { %v836_v39 = vadd.f32 %v835_v37, %v834_v33  ;;  %v849_v22 = vsel %vm497_vm1, %v807_v59, 0.0  ;;  %v3585_v48 = vsub.f32 %v3357_v54, %v3477_v10  ;;  %v810_v30 = vmul.f32 %v3571_v42, %v3571_v42 }
 0x1f9   : > { %v851_v31 = vsel %vm497_vm1, %v808_v61, 0.0  ;;  %v3592_v51 = vsub.f32 %v3362_v57, %v3477_v10  ;;  %v811_v34 = vmul.f32 %v3578_v45, %v3578_v45  ;;  %v853_v37 = vsel %vm497_vm1, %v809_v15, 0.0 }
 0x1fa   : > { %v838_v46 = vadd.f32 %v837_v43, %v836_v39  ;;  %v3599_v54 = vsub.f32 %v3367_v60, %v3477_v10  ;;  %v812_v41 = vmul.f32 %v3585_v48, %v3585_v48  ;;  %v855_v43 = vsel %vm497_vm1, %v810_v30, 0.0 }
 0x1fb   : > { %v3606_v57 = vsub.f32 %v3372_v63, %v3477_v10  ;;  %v813_v47 = vmul.f32 %v3592_v51, %v3592_v51  ;;  %v3613_v60 = vsub.f32 %v3377_v14, %v3477_v10  ;;  %v3620_v63 = vsub.f32 %v3382_v20, %v3477_v10 }
 0x1fc   : > { %v840_v6 = vadd.f32 %v839_v4, %v838_v46  ;;  %v857_v4 = vsel %vm497_vm1, %v811_v34, 0.0  ;;  %v814_v50 = vmul.f32 %v3599_v54, %v3599_v54  ;;  %v3627_v14 = vsub.f32 %v3387_v27, %v3477_v10 }
 0x1fd   : > { %v815_v3 = vmul.f32 %v3606_v57, %v3606_v57  ;;  %v816_v59 = vmul.f32 %v3613_v60, %v3613_v60  ;;  %v3634_v20 = vsub.f32 %v3392_v32, %v3477_v10  ;;  %v817_v61 = vmul.f32 %v3620_v63, %v3620_v63 }
 0x1fe   : > { %v842_v0 = vadd.f32 %v841_v52, %v840_v6  ;;  %v859_v52 = vsel %vm497_vm1, %v812_v41, 0.0  ;;  %v3641_v27 = vsub.f32 %v3397_v35, %v3477_v10  ;;  %v818_v15 = vmul.f32 %v3627_v14, %v3627_v14 }
 0x1ff   : > { %v3648_v32 = vsub.f32 %v3402_v40, %v3477_v10  ;;  %v819_v30 = vmul.f32 %v3634_v20, %v3634_v20  ;;  %v3655_v35 = vsub.f32 %v3407_v44, %v3477_v10  ;;  %v3662_v40 = vsub.f32 %v3412_v49, %v3477_v10 }
 0x200   : > { %v844_v56 = vadd.f32 %v843_v5, %v842_v0  ;;  %v861_v5 = vsel %vm497_vm1, %v813_v47, 0.0  ;;  %v820_v34 = vmul.f32 %v3641_v27, %v3641_v27  ;;  %v3669_v44 = vsub.f32 %v3417_v53, %v3477_v10 }
 0x201   : > { %v821_v41 = vmul.f32 %v3648_v32, %v3648_v32  ;;  %v822_v47 = vmul.f32 %v3655_v35, %v3655_v35  ;;  %v3676_v49 = vsub.f32 %v3422_v58, %v3477_v10  ;;  %v3683_v53 = vsub.f32 %v3427_v62, %v3477_v10 }
 0x202   : > { %v846_v11 = vadd.f32 %v845_v8, %v844_v56  ;;  %v863_v8 = vsel %vm497_vm1, %v814_v50, 0.0  ;;  %v823_v50 = vmul.f32 %v3662_v40, %v3662_v40  ;;  %v3690_v58 = vsub.f32 %v3432_v16, %v3477_v10 }
 0x203   : > { %v826_v62 = vmul.f32 %v3683_v53, %v3683_v53 }
 0x204   : > { %v848_v13 = vadd.f32 %v847_v12, %v846_v11  ;;  %v865_v12 = vsel %vm497_vm1, %v815_v3, 0.0  ;;  %v824_v3 = vmul.f32 %v3669_v44, %v3669_v44 }
 0x205   : > { %v887_v16 = vsel %vm497_vm1, %v826_v62, 0.0 }
 0x206   : > { %v850_v24 = vadd.f32 %v849_v22, %v848_v13  ;;  %v867_v22 = vsel %vm497_vm1, %v816_v59, 0.0  ;;  %v825_v59 = vmul.f32 %v3676_v49, %v3676_v49 }
 0x208   : > { %v852_v33 = vadd.f32 %v851_v31, %v850_v24  ;;  %v869_v31 = vsel %vm497_vm1, %v817_v61, 0.0  ;;  %v883_v61 = vsel %vm497_vm1, %v824_v3, 0.0  ;;  %v3723_v3 = vld [vmem:[%s4321_s9 + $0x18] sm:$0xff]  }
 0x20a   : > { %v854_v39 = vadd.f32 %v853_v37, %v852_v33  ;;  %v871_v37 = vsel %vm497_vm1, %v818_v15, 0.0  ;;  %v885_v15 = vsel %vm497_vm1, %v825_v59, 0.0 }
 0x20c   : > { %v856_v46 = vadd.f32 %v855_v43, %v854_v39  ;;  %v873_v43 = vsel %vm497_vm1, %v819_v30, 0.0 }
 0x20e   : > { %v858_v6 = vadd.f32 %v857_v4, %v856_v46  ;;  %v875_v4 = vsel %vm497_vm1, %v820_v34, 0.0 }
 0x210   : > { %v860_v0 = vadd.f32 %v859_v52, %v858_v6  ;;  %v877_v52 = vsel %vm497_vm1, %v821_v41, 0.0 }
 0x212   : > { %v862_v56 = vadd.f32 %v861_v5, %v860_v0  ;;  %v879_v5 = vsel %vm497_vm1, %v822_v47, 0.0 }
 0x214   : > { %v864_v11 = vadd.f32 %v863_v8, %v862_v56  ;;  %v881_v8 = vsel %vm497_vm1, %v823_v50, 0.0  ;;  %v2995_v50 = vld [vmem:[%s4317_s5 + $0x8] sm:$0xff]  }
 0x216   : > { %v866_v13 = vadd.f32 %v865_v12, %v864_v11 }
 0x218   : > { %v868_v24 = vadd.f32 %v867_v22, %v866_v13  ;;  %v827_v13 = vmul.f32 %v3690_v58, %v3690_v58 }
 0x21a   : > { %v870_v33 = vadd.f32 %v869_v31, %v868_v24  ;;  %v889_v24 = vsel %vm497_vm1, %v827_v13, 0.0 }
 0x21c   : > { %v872_v39 = vadd.f32 %v871_v37, %v870_v33 }
 0x21e   : > { %v874_v46 = vadd.f32 %v873_v43, %v872_v39 }
 0x220   : > { %v876_v6 = vadd.f32 %v875_v4, %v874_v46  ;;  %v2993_v4 = vld [vmem:[%s4317_s5 + $0x18] sm:$0xff]  }
 0x221   : > { %2870 = vmatprep.subr.bf16.mxu1 %v2993_v4  ;;  %2750 = vmatprep.subr.bf16.mxu0 %v2993_v4 }
 0x222   : > { %v878_v0 = vadd.f32 %v877_v52, %v876_v6  ;;  %v2994_v6 = vld [vmem:[%s4317_s5 + $0x10] sm:$0xff]   ;;  %v2996_v52 = vld [vmem:[%s4317_s5] sm:$0xff]  }
 0x224   : > { %v880_v56 = vadd.f32 %v879_v5, %v878_v0  ;;  %v2997_v0 = vld [vmem:[%s4319_s7 + $0x18] sm:$0xff]  }
 0x226   : > { %v882_v11 = vadd.f32 %v881_v8, %v880_v56  ;;  %v1046_v8 = vld [vmem:[%s4332_s1] sm:$0x1]  ;;  %s3011_s1 = sshll.u32 %s3071_s0, 4  ;;  %s3012_s1 = int_to_ptr.vmem [resolvable:$false] %s3011_s1 }
 0x227   : > { %s3013_s22 = scalar_lea.vmem %s3012_s1, 2048 }
 0x228   : > { %v884_v12 = vadd.f32 %v883_v61, %v882_v11 }
 0x22a   : > { %v886_v22 = vadd.f32 %v885_v15, %v884_v12  ;;  %v3736_v12 = vld [vmem:[%s4333_s2] ss:$0 sm:$0xff] }
 0x22c   : > { %v888_v10 = vadd.f32 %v887_v16, %v886_v22 }
 0x22e   : > { %v890_v30 = vadd.f32 %v889_v24, %v888_v10 }
 0x230   : > { %v891_v31 = vrot.slane %v890_v30, 4 }
 0x232   : > { %v892_v33 = vadd.f32 %v891_v31, %v890_v30 }
 0x234   : > { %v893_v34 = vrot.slane %v892_v33, 2 }
 0x236   : > { %v894_v37 = vadd.f32 %v893_v34, %v892_v33 }
 0x238   : > { %v895_v39 = vrot.slane %v894_v37, 1 }
 0x23a   : > { %v896_v41 = vadd.f32 %v895_v39, %v894_v37 }
 0x23c   : > { %2737 = vmatmul.mubr.msk.f32.vlgmr.msra.gmra.mxu1 %vm497_vm1, %v896_v41 }
 0x23d   : > { %2874 = vmatpush3.bf16.msra.mxu1 %v2993_v4 }
 0x23e   : > { %2871 = vmatprep.subr.bf16.mxu1 %v2994_v6 }
 0x241   : > { %2875 = vmatpush3.bf16.msra.mxu1 %v2994_v6 }
 0x242   : > { %2872 = vmatprep.subr.bf16.mxu1 %v2995_v50 }
 0x245   : > { %2876 = vmatpush3.bf16.msra.mxu1 %v2995_v50 }
 0x246   : > { %2873 = vmatprep.subr.bf16.mxu1 %v2996_v52 }
 0x249   : > { %2877 = vmatpush3.bf16.msra.mxu1 %v2996_v52 }
 0x24a   : > { %2790 = vmatprep.subr.bf16.mxu1 %v2997_v0 }
 0x2fc   : > { %v967_v43 = vpop.f32.mrf.mxu1 }
 0x2fd   : > { %v971_v46 = vmul.f32 0.001953125, %v967_v43 }
 0x2fe   : > { %v2738_v47 = vpop.f32.mrf.mxu1 }
 0x2ff   : > { %2748 = vmatmul.mubr.msk.f32.vlgmr.msra.gmra.mxu0 %vm654_vm2, %v971_v46  ;;  %v2998_v46 = vld [vmem:[%s4319_s7 + $0x10] sm:$0xff]  }
 0x300   : > { %2751 = vmatpush3.bf16.msra.mxu0 %v2993_v4 }
 0x301   : > { %2752 = vmatprep.subr.bf16.mxu0 %v2994_v6 }
 0x304   : > { %2753 = vmatpush3.bf16.msra.mxu0 %v2994_v6 }
 0x305   : > { %2754 = vmatprep.subr.bf16.mxu0 %v2995_v50 }
 0x308   : > { %2755 = vmatpush3.bf16.msra.mxu0 %v2995_v50 }
 0x309   : > { %2756 = vmatprep.subr.bf16.mxu0 %v2996_v52 }
 0x30c   : > { %2757 = vmatpush3.bf16.msra.mxu0 %v2996_v52 }
 0x30d   : > { %2830 = vmatprep.subr.bf16.mxu0 %v3723_v3 }
 0x3bf   : > { %v1041_v5 = vpop.f32.mrf.mxu0 }
 0x3c0   : > { %v1042_v56 = vadd.f32 1e-05, %v1041_v5 }
 0x3c1   : > { %v2749_v59 = vpop.f32.mrf.mxu0 }
 0x3c2   : > { %3005 = vrsqrt.f32 %v1042_v56 }
 0x3cf   : > { %v3006_v11 = vpop.eup %3005 }
 0x3d0   : > { %v1047_v62 = vmul.f32 %v3006_v11, %v1046_v8 }
 0x3d2   : > { %v3731_v61 = vrot.slane %v1047_v62, %v762_v55 }
 0x3d4   : > { %v1053_v13 = vmul.f32 %v3731_v61, %v3481_v17  ;;  %v1054_v15 = vmul.f32 %v3731_v61, %v3485_v1  ;;  %v1069_v22 = vmul.f32 %v3731_v61, %v3585_v48  ;;  %v1070_v16 = vmul.f32 %v3731_v61, %v3592_v51 }
 0x3d5   : > { %v1055_v2 = vmul.f32 %v3731_v61, %v3489_v21  ;;  %v1056_v55 = vmul.f32 %v3731_v61, %v3493_v25  ;;  %v1071_v10 = vmul.f32 %v3731_v61, %v3599_v54  ;;  %v1072_v17 = vmul.f32 %v3731_v61, %v3606_v57 }
 0x3d6   : > { %v1091_v1 = vadd.f32 %v3736_v12, %v1053_v13  ;;  %v1092_v24 = vadd.f32 %v3736_v12, %v1054_v15  ;;  %v1107_v48 = vadd.f32 %v3736_v12, %v1069_v22  ;;  %v1108_v51 = vadd.f32 %v3736_v12, %v1070_v16 }
 0x3d7   : > { %v1093_v30 = vadd.f32 %v3736_v12, %v1055_v2  ;;  %v1094_v21 = vadd.f32 %v3736_v12, %v1056_v55  ;;  %v1109_v25 = vadd.f32 %v3736_v12, %v1071_v10  ;;  %v1110_v31 = vadd.f32 %v3736_v12, %v1072_v17 }
 0x3d8   : > { %v3762_v54 = vpack.c.bf16 %v1092_v24, %v1091_v1  ;;  %v3764_v33 = vpack.c.bf16 %v1108_v51, %v1107_v48  ;;  %v1057_v57 = vmul.f32 %v3731_v61, %v3501_v7  ;;  %v1058_v34 = vmul.f32 %v3731_v61, %v3507_v9 }
 0x3d9   : > { %v3770_v37 = vpack.c.bf16 %v1094_v21, %v1093_v30  ;;  %v3772_v39 = vpack.c.bf16 %v1110_v31, %v1109_v25  ;;  %v1073_v41 = vmul.f32 %v3731_v61, %v3613_v60  ;;  %v1074_v43 = vmul.f32 %v3731_v61, %v3620_v63 }
 0x3da   : > { %2758 = vmatprep.mubr.msk.bf16.mxu0 %vm497_vm1, %v3762_v54  ;;  %2774 = vmatprep.mubr.msk.bf16.mxu1 %vm497_vm1, %v3764_v33  ;;  %v1095_v7 = vadd.f32 %v3736_v12, %v1057_v57  ;;  %v1096_v9 = vadd.f32 %v3736_v12, %v1058_v34  ;;  %v1059_v60 = vmul.f32 %v3731_v61, %v3515_v18 }
 0x3db   : > { %2759 = vmatmul.mubr.msk.bf16.vlgmr.msra.gmra.mxu0 %vm497_vm1, %v3770_v37  ;;  %2775 = vmatmul.mubr.msk.bf16.vlgmr.msra.gmra.mxu1 %vm497_vm1, %v3772_v39  ;;  %v1111_v63 = vadd.f32 %v3736_v12, %v1073_v41  ;;  %v1112_v47 = vadd.f32 %v3736_v12, %v1074_v43  ;;  %v1060_v4 = vmul.f32 %v3731_v61, %v3522_v19  ;;  %v3004_v43 = vld [vmem:[%s4321_s9] sm:$0xff]  }
 0x3dc   : > { %2791 = vmatpush3.bf16.msra.mxu1 %v2997_v0  ;;  %v3797_v6 = vpack.c.bf16 %v1096_v9, %v1095_v7  ;;  %v1097_v50 = vadd.f32 %v3736_v12, %v1059_v60  ;;  %v1075_v18 = vmul.f32 %v3731_v61, %v3627_v14  ;;  %v1076_v52 = vmul.f32 %v3731_v61, %v3634_v20  ;;  %v2999_v0 = vld [vmem:[%s4319_s7 + $0x8] sm:$0xff]  }
 0x3dd   : > { %v3804_v5 = vpack.c.bf16 %v1112_v47, %v1111_v63  ;;  %2792 = vmatprep.subr.bf16.mxu1 %v2998_v46  ;;  %v1098_v56 = vadd.f32 %v3736_v12, %v1060_v4  ;;  %v1061_v59 = vmul.f32 %v3731_v61, %v3529_v23  ;;  %v1062_v19 = vmul.f32 %v3731_v61, %v3536_v26 }
 0x3de   : > { %2762 = vmatprep.mubr.msk.bf16.mxu0 %vm497_vm1, %v3797_v6  ;;  %v1113_v14 = vadd.f32 %v3736_v12, %v1075_v18  ;;  %v1114_v20 = vadd.f32 %v3736_v12, %v1076_v52  ;;  %v1077_v8 = vmul.f32 %v3731_v61, %v3641_v27  ;;  %v1078_v23 = vmul.f32 %v3731_v61, %v3648_v32 }
 0x3df   : > { %2778 = vmatprep.mubr.msk.bf16.mxu1 %vm497_vm1, %v3804_v5  ;;  %v1099_v26 = vadd.f32 %v3736_v12, %v1061_v59  ;;  %v1100_v11 = vadd.f32 %v3736_v12, %v1062_v19  ;;  %v1063_v62 = vmul.f32 %v3731_v61, %v3543_v28  ;;  %v1064_v27 = vmul.f32 %v3731_v61, %v3550_v29  ;;  %v3001_v28 = vld [vmem:[%s4321_s9 + $0x10] sm:$0xff]  }
 0x3e0   : > { %2793 = vmatpush3.bf16.msra.mxu1 %v2998_v46  ;;  %v1115_v13 = vadd.f32 %v3736_v12, %v1077_v8  ;;  %v1116_v15 = vadd.f32 %v3736_v12, %v1078_v23  ;;  %v3832_v22 = vpack.c.bf16 %v1098_v56, %v1097_v50  ;;  %v3834_v32 = vpack.c.bf16 %v1114_v20, %v1113_v14 }
 0x3e1   : > { %2794 = vmatprep.subr.bf16.mxu1 %v2999_v0  ;;  %v1079_v16 = vmul.f32 %v3731_v61, %v3655_v35  ;;  %v1080_v2 = vmul.f32 %v3731_v61, %v3662_v40  ;;  %v1127_v55 = vpack.c.bf16 %v1100_v11, %v1099_v26  ;;  %v1065_v29 = vmul.f32 %v3731_v61, %v3557_v36  ;;  %v3002_v35 = vld [vmem:[%s4319_s7] sm:$0xff]  }
 0x3e2   : > { %v3843_v10 = vpack.c.bf16 %v1116_v15, %v1115_v13  ;;  %v1066_v17 = vmul.f32 %v3731_v61, %v3564_v38  ;;  %2831 = vmatpush3.bf16.msra.mxu0 %v3723_v3  ;;  %v1101_v40 = vadd.f32 %v3736_v12, %v1063_v62  ;;  %v1081_v36 = vmul.f32 %v3731_v61, %v3669_v44  ;;  %v3003_v38 = vld [vmem:[%s4321_s9 + $0x8] sm:$0xff]  }
 0x3e3   : > { %2763 = vmatmul.mubr.msk.bf16.gmra.mxu0 %vm497_vm1, %v3832_v22  ;;  %2779 = vmatmul.mubr.msk.bf16.gmra.mxu1 %vm497_vm1, %v3834_v32  ;;  %v1102_v3 = vadd.f32 %v3736_v12, %v1064_v27  ;;  %v1117_v1 = vadd.f32 %v3736_v12, %v1079_v16  ;;  %v1118_v24 = vadd.f32 %v3736_v12, %v1080_v2 }
 0x3e4   : > { %2766 = vmatprep.mubr.msk.bf16.mxu0 %vm497_vm1, %v1127_v55  ;;  %2782 = vmatprep.mubr.msk.bf16.mxu1 %vm497_vm1, %v3843_v10  ;;  %v1082_v48 = vmul.f32 %v3731_v61, %v3676_v49  ;;  %v1103_v44 = vadd.f32 %v3736_v12, %v1065_v29  ;;  %v1104_v51 = vadd.f32 %v3736_v12, %v1066_v17 }
 0x3e5   : > { %2795 = vmatpush3.bf16.msra.mxu1 %v2999_v0  ;;  %2832 = vmatprep.subr.bf16.mxu0 %v3001_v28  ;;  %v1119_v30 = vadd.f32 %v3736_v12, %v1081_v36  ;;  %v1128_v25 = vpack.c.bf16 %v1102_v3, %v1101_v40  ;;  %v1136_v31 = vpack.c.bf16 %v1118_v24, %v1117_v1 }
 0x3e6   : > { %2833 = vmatpush3.bf16.msra.mxu0 %v3001_v28  ;;  %2796 = vmatprep.subr.bf16.mxu1 %v3002_v35  ;;  %v1120_v21 = vadd.f32 %v3736_v12, %v1082_v48  ;;  %v1067_v57 = vmul.f32 %v3731_v61, %v3571_v42  ;;  %v1068_v49 = vmul.f32 %v3731_v61, %v3578_v45 }
 0x3e7   : > { %2834 = vmatprep.subr.bf16.mxu0 %v3003_v38  ;;  %v1083_v34 = vmul.f32 %v3731_v61, %v3683_v53  ;;  %v1084_v41 = vmul.f32 %v3731_v61, %v3690_v58  ;;  %v1129_v46 = vpack.c.bf16 %v1104_v51, %v1103_v44 }
 0x3e8   : > { %v1137_v7 = vpack.c.bf16 %v1120_v21, %v1119_v30  ;;  %v1105_v42 = vadd.f32 %v3736_v12, %v1067_v57  ;;  %v1106_v45 = vadd.f32 %v3736_v12, %v1068_v49 }
 0x3e9   : > { %2797 = vmatpush3.bf16.msra.mxu1 %v3002_v35  ;;  %v1121_v53 = vadd.f32 %v3736_v12, %v1083_v34  ;;  %v1122_v58 = vadd.f32 %v3736_v12, %v1084_v41  ;;  %v3949_v12 = vld [vmem:[%s4318_s6] ss:$0 sm:$0xff] }
 0x3ea   : > { %2835 = vmatpush3.bf16.msra.mxu0 %v3003_v38  ;;  %v1130_v61 = vpack.c.bf16 %v1106_v45, %v1105_v42 }
 0x3eb   : > { %2767 = vmatmul.mubr.msk.bf16.gmra.mxu0 %vm497_vm1, %v1128_v25  ;;  %2783 = vmatmul.mubr.msk.bf16.gmra.mxu1 %vm497_vm1, %v1136_v31  ;;  %v1138_v9 = vpack.c.bf16 %v1122_v58, %v1121_v53 }
 0x3ec   : > { %2770 = vmatprep.mubr.msk.bf16.mxu0 %vm497_vm1, %v1129_v46  ;;  %2786 = vmatprep.mubr.msk.bf16.mxu1 %vm497_vm1, %v1137_v7 }
 0x3ed   : > { %2836 = vmatprep.subr.bf16.mxu0 %v3004_v43 }
 0x3ee   : > { %2837 = vmatpush3.bf16.msra.mxu0 %v3004_v43 }
 0x3f3   : > { %2771 = vmatmul.mubr.msk.bf16.gmra.mxu0 %vm497_vm1, %v1130_v61  ;;  %2787 = vmatmul.mubr.msk.bf16.gmra.mxu1 %vm497_vm1, %v1138_v9 }
 0x3f4   : > { %2798 = vmatprep.mubr.msk.bf16.mxu1 %vm497_vm1, %v3762_v54  ;;  %2838 = vmatprep.mubr.msk.bf16.mxu0 %vm497_vm1, %v3762_v54 }
 0x3fb   : > { %2799 = vmatmul.mubr.msk.bf16.vlgmr.msra.gmra.mxu1 %vm497_vm1, %v3770_v37  ;;  %2839 = vmatmul.mubr.msk.bf16.vlgmr.msra.gmra.mxu0 %vm497_vm1, %v3770_v37 }
 0x3fc   : > { %2802 = vmatprep.mubr.msk.bf16.mxu1 %vm497_vm1, %v3797_v6  ;;  %2842 = vmatprep.mubr.msk.bf16.mxu0 %vm497_vm1, %v3797_v6 }
 0x403   : > { %2803 = vmatmul.mubr.msk.bf16.gmra.mxu1 %vm497_vm1, %v3832_v22  ;;  %2843 = vmatmul.mubr.msk.bf16.gmra.mxu0 %vm497_vm1, %v3832_v22 }
 0x404   : > { %2806 = vmatprep.mubr.msk.bf16.mxu1 %vm497_vm1, %v1127_v55  ;;  %2846 = vmatprep.mubr.msk.bf16.mxu0 %vm497_vm1, %v1127_v55 }
 0x40b   : > { %2807 = vmatmul.mubr.msk.bf16.gmra.mxu1 %vm497_vm1, %v1128_v25  ;;  %2847 = vmatmul.mubr.msk.bf16.gmra.mxu0 %vm497_vm1, %v1128_v25 }
 0x40c   : > { %2810 = vmatprep.mubr.msk.bf16.mxu1 %vm497_vm1, %v1129_v46  ;;  %2850 = vmatprep.mubr.msk.bf16.mxu0 %vm497_vm1, %v1129_v46 }
 0x413   : > { %2811 = vmatmul.mubr.msk.bf16.gmra.mxu1 %vm497_vm1, %v1130_v61  ;;  %2851 = vmatmul.mubr.msk.bf16.gmra.mxu0 %vm497_vm1, %v1130_v61 }
 0x414   : > { %2814 = vmatprep.mubr.msk.bf16.mxu1 %vm497_vm1, %v3764_v33  ;;  %2854 = vmatprep.mubr.msk.bf16.mxu0 %vm497_vm1, %v3764_v33 }
 0x41b   : > { %2815 = vmatmul.mubr.msk.bf16.gmra.mxu1 %vm497_vm1, %v3772_v39  ;;  %2855 = vmatmul.mubr.msk.bf16.gmra.mxu0 %vm497_vm1, %v3772_v39 }
 0x41c   : > { %2818 = vmatprep.mubr.msk.bf16.mxu1 %vm497_vm1, %v3804_v5  ;;  %2858 = vmatprep.mubr.msk.bf16.mxu0 %vm497_vm1, %v3804_v5 }
 0x423   : > { %2819 = vmatmul.mubr.msk.bf16.gmra.mxu1 %vm497_vm1, %v3834_v32  ;;  %2859 = vmatmul.mubr.msk.bf16.gmra.mxu0 %vm497_vm1, %v3834_v32 }
 0x424   : > { %2822 = vmatprep.mubr.msk.bf16.mxu1 %vm497_vm1, %v3843_v10  ;;  %2862 = vmatprep.mubr.msk.bf16.mxu0 %vm497_vm1, %v3843_v10 }
 0x42b   : > { %2823 = vmatmul.mubr.msk.bf16.gmra.mxu1 %vm497_vm1, %v1136_v31  ;;  %2863 = vmatmul.mubr.msk.bf16.gmra.mxu0 %vm497_vm1, %v1136_v31 }
 0x42c   : > { %2826 = vmatprep.mubr.msk.bf16.mxu1 %vm497_vm1, %v1137_v7  ;;  %2866 = vmatprep.mubr.msk.bf16.mxu0 %vm497_vm1, %v1137_v7 }
 0x433   : > { %2827 = vmatmul.mubr.msk.bf16.gmra.mxu1 %vm497_vm1, %v1138_v9  ;;  %2867 = vmatmul.mubr.msk.bf16.gmra.mxu0 %vm497_vm1, %v1138_v9 }
 0x49b   : > { %v2760_v54 = vpop.f32.mrf.mxu0  ;;  %v2776_v33 = vpop.f32.mrf.mxu1 }
 0x49c   : > { %v1269_v37 = vadd.f32 %v2760_v54, %v3949_v12  ;;  %v1333_v39 = vadd.f32 %v2776_v33, %v3949_v12 }
 0x49d   : > { %v1260_v60 = vpop.f32.mrf.mxu0  ;;  %v1324_v63 = vpop.f32.mrf.mxu1 }
 0x49e   : > { %v2531_v47 = vpack.c.bf16 %v1269_v37, %v1269_v37  ;;  %v2547_v4 = vpack.c.bf16 %v1333_v39, %v1333_v39  ;;  %v1261_v6 = vadd.f32 %v3949_v12, %v1260_v60  ;;  %v1325_v50 = vadd.f32 %v3949_v12, %v1324_v63 }
 0x49f   : > { %v2761_v18 = vpop.f32.mrf.mxu0  ;;  %v2777_v52 = vpop.f32.mrf.mxu1 }
 0x4a0   : > { %1518 = vst.msk [vmem:[%s3959_s30 + $0x8] sm:$0xf] %vm1515_vm3, %v2531_v47  ;;  %1534 = vst.msk [vmem:[%s3959_s30 + $0x48] sm:$0xf] %vm1515_vm3, %v2547_v4  ;;  %v2529_v5 = vpack.c.bf16 %v1261_v6, %v1261_v6  ;;  %v2545_v56 = vpack.c.bf16 %v1325_v50, %v1325_v50  ;;  %v1272_v59 = vadd.f32 %v2761_v18, %v3949_v12 }
 0x4a1   : > { %v1336_v19 = vadd.f32 %v2777_v52, %v3949_v12  ;;  %v1263_v0 = vpop.f32.mrf.mxu0  ;;  %v1327_v14 = vpop.f32.mrf.mxu1 }
 0x4a2   : > { %1516 = vst.msk [vmem:[%s3959_s30] sm:$0xf] %vm1515_vm3, %v2529_v5  ;;  %1532 = vst.msk [vmem:[%s3959_s30 + $0x40] sm:$0xf] %vm1515_vm3, %v2545_v56  ;;  %v2532_v20 = vpack.c.bf16 %v1272_v59, %v1272_v59  ;;  %v1264_v23 = vadd.f32 %v3949_v12, %v1263_v0  ;;  %v1328_v26 = vadd.f32 %v3949_v12, %v1327_v14 }
 0x4a3   : > { %v2548_v8 = vpack.c.bf16 %v1336_v19, %v1336_v19  ;;  %v2764_v11 = vpop.f32.mrf.mxu0  ;;  %v2780_v62 = vpop.f32.mrf.mxu1 }
 0x4a4   : > { %1519 = vst.msk [vmem:[%s3959_s30 + $0xc] sm:$0xf] %vm1515_vm3, %v2532_v20  ;;  %v2530_v13 = vpack.c.bf16 %v1264_v23, %v1264_v23  ;;  %v2546_v15 = vpack.c.bf16 %v1328_v26, %v1328_v26  ;;  %v1285_v27 = vadd.f32 %v2764_v11, %v3949_v12  ;;  %v1349_v22 = vadd.f32 %v2780_v62, %v3949_v12 }
 0x4a5   : > { %1535 = vst.msk [vmem:[%s3959_s30 + $0x4c] sm:$0xf] %vm1515_vm3, %v2548_v8  ;;  %v1276_v32 = vpop.f32.mrf.mxu0  ;;  %v1340_v16 = vpop.f32.mrf.mxu1 }
 0x4a6   : > { %1517 = vst.msk [vmem:[%s3959_s30 + $0x4] sm:$0xf] %vm1515_vm3, %v2530_v13  ;;  %1533 = vst.msk [vmem:[%s3959_s30 + $0x44] sm:$0xf] %vm1515_vm3, %v2546_v15  ;;  %v2535_v2 = vpack.c.bf16 %v1285_v27, %v1285_v27  ;;  %v2551_v28 = vpack.c.bf16 %v1349_v22, %v1349_v22  ;;  %v1277_v55 = vadd.f32 %v3949_v12, %v1276_v32  ;;  %v4044_v22 = vld [vmem:[%s4322_s10] ss:$0 sm:$0xff] }
 0x4a7   : > { %v1341_v10 = vadd.f32 %v3949_v12, %v1340_v16  ;;  %v2765_v29 = vpop.f32.mrf.mxu0  ;;  %v2781_v17 = vpop.f32.mrf.mxu1 }
 0x4a8   : > { %1522 = vst.msk [vmem:[%s3959_s30 + $0x18] sm:$0xf] %vm1515_vm3, %v2535_v2  ;;  %1538 = vst.msk [vmem:[%s3959_s30 + $0x58] sm:$0xf] %vm1515_vm3, %v2551_v28  ;;  %v2533_v35 = vpack.c.bf16 %v1277_v55, %v1277_v55  ;;  %v1288_v36 = vadd.f32 %v2765_v29, %v3949_v12  ;;  %v1352_v38 = vadd.f32 %v2781_v17, %v3949_v12 }
 0x4a9   : > { %v2549_v40 = vpack.c.bf16 %v1341_v10, %v1341_v10  ;;  %v1279_v3 = vpop.f32.mrf.mxu0  ;;  %v1343_v1 = vpop.f32.mrf.mxu1 }
 0x4aa   : > { %1520 = vst.msk [vmem:[%s3959_s30 + $0x10] sm:$0xf] %vm1515_vm3, %v2533_v35  ;;  %v2536_v24 = vpack.c.bf16 %v1288_v36, %v1288_v36  ;;  %v2552_v48 = vpack.c.bf16 %v1352_v38, %v1352_v38  ;;  %v1280_v44 = vadd.f32 %v3949_v12, %v1279_v3  ;;  %v1344_v51 = vadd.f32 %v3949_v12, %v1343_v1 }
 0x4ab   : > { %1536 = vst.msk [vmem:[%s3959_s30 + $0x50] sm:$0xf] %vm1515_vm3, %v2549_v40  ;;  %v2768_v30 = vpop.f32.mrf.mxu0  ;;  %v2784_v21 = vpop.f32.mrf.mxu1 }
 0x4ac   : > { %1523 = vst.msk [vmem:[%s3959_s30 + $0x1c] sm:$0xf] %vm1515_vm3, %v2536_v24  ;;  %1539 = vst.msk [vmem:[%s3959_s30 + $0x5c] sm:$0xf] %vm1515_vm3, %v2552_v48  ;;  %v2534_v25 = vpack.c.bf16 %v1280_v44, %v1280_v44  ;;  %v2550_v31 = vpack.c.bf16 %v1344_v51, %v1344_v51  ;;  %v1301_v57 = vadd.f32 %v2768_v30, %v3949_v12 }
 0x4ad   : > { %v1365_v49 = vadd.f32 %v2784_v21, %v3949_v12  ;;  %v1292_v34 = vpop.f32.mrf.mxu0  ;;  %v1356_v41 = vpop.f32.mrf.mxu1 }
 0x4ae   : > { %1521 = vst.msk [vmem:[%s3959_s30 + $0x14] sm:$0xf] %vm1515_vm3, %v2534_v25  ;;  %1537 = vst.msk [vmem:[%s3959_s30 + $0x54] sm:$0xf] %vm1515_vm3, %v2550_v31  ;;  %v2539_v43 = vpack.c.bf16 %v1301_v57, %v1301_v57  ;;  %v1293_v7 = vadd.f32 %v3949_v12, %v1292_v34  ;;  %v1357_v42 = vadd.f32 %v3949_v12, %v1356_v41 }
 0x4af   : > { %v2555_v46 = vpack.c.bf16 %v1365_v49, %v1365_v49  ;;  %v2769_v45 = vpop.f32.mrf.mxu0  ;;  %v2785_v53 = vpop.f32.mrf.mxu1 }
 0x4b0   : > { %1526 = vst.msk [vmem:[%s3959_s30 + $0x28] sm:$0xf] %vm1515_vm3, %v2539_v43  ;;  %v2537_v58 = vpack.c.bf16 %v1293_v7, %v1293_v7  ;;  %v2553_v61 = vpack.c.bf16 %v1357_v42, %v1357_v42  ;;  %v1304_v9 = vadd.f32 %v2769_v45, %v3949_v12  ;;  %v1368_v54 = vadd.f32 %v2785_v53, %v3949_v12 }
 0x4b1   : > { %1542 = vst.msk [vmem:[%s3959_s30 + $0x68] sm:$0xf] %vm1515_vm3, %v2555_v46  ;;  %v1295_v33 = vpop.f32.mrf.mxu0  ;;  %v1359_v37 = vpop.f32.mrf.mxu1 }
 0x4b2   : > { %1524 = vst.msk [vmem:[%s3959_s30 + $0x20] sm:$0xf] %vm1515_vm3, %v2537_v58  ;;  %1540 = vst.msk [vmem:[%s3959_s30 + $0x60] sm:$0xf] %vm1515_vm3, %v2553_v61  ;;  %v2540_v39 = vpack.c.bf16 %v1304_v9, %v1304_v9  ;;  %v2556_v60 = vpack.c.bf16 %v1368_v54, %v1368_v54  ;;  %v1296_v63 = vadd.f32 %v3949_v12, %v1295_v33 }
 0x4b3   : > { %v1360_v47 = vadd.f32 %v3949_v12, %v1359_v37  ;;  %v2772_v4 = vpop.f32.mrf.mxu0  ;;  %v2788_v6 = vpop.f32.mrf.mxu1 }
 0x4b4   : > { %1527 = vst.msk [vmem:[%s3959_s30 + $0x2c] sm:$0xf] %vm1515_vm3, %v2540_v39  ;;  %1543 = vst.msk [vmem:[%s3959_s30 + $0x6c] sm:$0xf] %vm1515_vm3, %v2556_v60  ;;  %v2538_v50 = vpack.c.bf16 %v1296_v63, %v1296_v63  ;;  %v1317_v52 = vadd.f32 %v2772_v4, %v3949_v12  ;;  %v1381_v5 = vadd.f32 %v2788_v6, %v3949_v12 }
 0x4b5   : > { %v2554_v18 = vpack.c.bf16 %v1360_v47, %v1360_v47  ;;  %v1308_v56 = vpop.f32.mrf.mxu0  ;;  %v1372_v59 = vpop.f32.mrf.mxu1 }
 0x4b6   : > { %1525 = vst.msk [vmem:[%s3959_s30 + $0x24] sm:$0xf] %vm1515_vm3, %v2538_v50  ;;  %v2543_v19 = vpack.c.bf16 %v1317_v52, %v1317_v52  ;;  %v2559_v0 = vpack.c.bf16 %v1381_v5, %v1381_v5  ;;  %v1309_v14 = vadd.f32 %v3949_v12, %v1308_v56  ;;  %v1373_v20 = vadd.f32 %v3949_v12, %v1372_v59 }
 0x4b7   : > { %1541 = vst.msk [vmem:[%s3959_s30 + $0x64] sm:$0xf] %vm1515_vm3, %v2554_v18  ;;  %v2773_v8 = vpop.f32.mrf.mxu0  ;;  %v2789_v23 = vpop.f32.mrf.mxu1 }
 0x4b8   : > { %1530 = vst.msk [vmem:[%s3959_s30 + $0x38] sm:$0xf] %vm1515_vm3, %v2543_v19  ;;  %1546 = vst.msk [vmem:[%s3959_s30 + $0x78] sm:$0xf] %vm1515_vm3, %v2559_v0  ;;  %v2541_v26 = vpack.c.bf16 %v1309_v14, %v1309_v14  ;;  %v2557_v11 = vpack.c.bf16 %v1373_v20, %v1373_v20  ;;  %v1320_v62 = vadd.f32 %v2773_v8, %v3949_v12 }
 0x4b9   : > { %v1384_v13 = vadd.f32 %v2789_v23, %v3949_v12  ;;  %v1311_v15 = vpop.f32.mrf.mxu0  ;;  %v1375_v27 = vpop.f32.mrf.mxu1 }
 0x4ba   : > { %1528 = vst.msk [vmem:[%s3959_s30 + $0x30] sm:$0xf] %vm1515_vm3, %v2541_v26  ;;  %1544 = vst.msk [vmem:[%s3959_s30 + $0x70] sm:$0xf] %vm1515_vm3, %v2557_v11  ;;  %v2544_v32 = vpack.c.bf16 %v1320_v62, %v1320_v62  ;;  %v1312_v2 = vadd.f32 %v3949_v12, %v1311_v15  ;;  %v1376_v28 = vadd.f32 %v3949_v12, %v1375_v27 }
 0x4bb   : > { %v2560_v16 = vpack.c.bf16 %v1384_v13, %v1384_v13  ;;  %v4052_v55 = vpop.f32.mrf.mxu1  ;;  %v2840_v10 = vpop.f32.mrf.mxu0 }
 0x4bc   : > { %1531 = vst.msk [vmem:[%s3959_s30 + $0x3c] sm:$0xf] %vm1515_vm3, %v2544_v32  ;;  %v2542_v29 = vpack.c.bf16 %v1312_v2, %v1312_v2  ;;  %v2558_v17 = vpack.c.bf16 %v1376_v28, %v1376_v28  ;;  %v1950_v35 = vadd.f32 %v2840_v10, %v4044_v22 }
 0x4bd   : > { %1547 = vst.msk [vmem:[%s3959_s30 + $0x7c] sm:$0xf] %vm1515_vm3, %v2560_v16  ;;  %v4066_v12 = vpop.f32.mrf.mxu1  ;;  %v1941_v40 = vpop.f32.mrf.mxu0 }
 0x4be   : > { %1529 = vst.msk [vmem:[%s3959_s30 + $0x34] sm:$0xf] %vm1515_vm3, %v2542_v29  ;;  %1545 = vst.msk [vmem:[%s3959_s30 + $0x74] sm:$0xf] %vm1515_vm3, %v2558_v17  ;;  %v2571_v36 = vpack.c.bf16 %v1950_v35, %v1950_v35  ;;  %v1942_v38 = vadd.f32 %v4044_v22, %v1941_v40  ;;  %s439_s30 = sand.u32 1, %s3059_s26  }
 0x4bf   : > { %v4073_v3 = vpop.f32.mrf.mxu1  ;;  %v2841_v1 = vpop.f32.mrf.mxu0  ;;  %s2374_s16 = sshll.u32 %s439_s30, 6 }
 0x4c0   : > { %2198 = vst.msk [vmem:[%s4064_s24 + $0x8] sm:$0xf] %vm1515_vm3, %v2571_v36  ;;  %v2569_v24 = vpack.c.bf16 %v1942_v38, %v1942_v38  ;;  %v1953_v48 = vadd.f32 %v2841_v1, %v4044_v22  ;;  %v4149_v38 = vld [vmem:[%s4320_s8] ss:$0 sm:$0xff]  ;;  %s4251_s20 = scalar_lea.vmem [#allocation2], %s2374_s16  ;;  %s4272_s16 = scalar_lea.sflag [#allocation3], %s439_s30 }
 0x4c1   : > { %v4078_v44 = vpop.f32.mrf.mxu1  ;;  %v1944_v51 = vpop.f32.mrf.mxu0  ;;  %s2255_s21 = sshll.u32 %s4251_s20, 4  ;;  %s4267_s21 = int_to_ptr.vmem [resolvable:$true] %s2255_s21 }
 0x4c2   : > { %2196 = vst.msk [vmem:[%s4064_s24] sm:$0xf] %vm1515_vm3, %v2569_v24  ;;  %v2572_v30 = vpack.c.bf16 %v1953_v48, %v1953_v48  ;;  %v1945_v21 = vadd.f32 %v4044_v22, %v1944_v51  ;;  %v1622_v48 = vadd.f32 %v4149_v38, %v4066_v12  ;;  %v1625_v12 = vadd.f32 %v4149_v38, %v4078_v44  ;;  %s3007_s29 = scalar_lea.vmem %s4267_s21, 1024  ;;  %p3014_p0 = scmp.lt.s32.totalorder %s4267_s21, %s3012_s1 }
 0x4c3   : > { %v4083_v25 = vpop.f32.mrf.mxu1  ;;  %v2844_v31 = vpop.f32.mrf.mxu0  ;;  %p3008_p11 = scmp.ne.s32.totalorder %s4267_s21, %s3007_s29  ;;  %p3015_p1 = scmp.lt.s32.totalorder %s3013_s22, %s3007_s29 }
 0x4c4   : > { %2199 = vst.msk [vmem:[%s4064_s24 + $0xc] sm:$0xf] %vm1515_vm3, %v2572_v30  ;;  %v2570_v57 = vpack.c.bf16 %v1945_v21, %v1945_v21  ;;  %v1966_v49 = vadd.f32 %v2844_v31, %v4044_v22 }
 0x4c5   : > { %v4088_v34 = vpop.f32.mrf.mxu1  ;;  %v1957_v41 = vpop.f32.mrf.mxu0  ;;  %p3009_p12 = pnand %p3008_p11, %p3182_p5  ;;  %p3016_p2 = por %p3015_p1, %p3014_p0 }
 0x4c6   : > { %2197 = vst.msk [vmem:[%s4064_s24 + $0x4] sm:$0xf] %vm1515_vm3, %v2570_v57  ;;  %v2575_v43 = vpack.c.bf16 %v1966_v49, %v1966_v49  ;;  %v1958_v46 = vadd.f32 %v4044_v22, %v1957_v41 }
 0x4c7   : > { %v4093_v7 = vpop.f32.mrf.mxu1  ;;  %v2845_v42 = vpop.f32.mrf.mxu0  ;;  %p3010_p13 = pneg %p3009_p12 }
 0x4c8   : > { %2202 = vst.msk [vmem:[%s4064_s24 + $0x18] sm:$0xf] %vm1515_vm3, %v2575_v43  ;;  %v2573_v45 = vpack.c.bf16 %v1958_v46, %v1958_v46  ;;  %v1969_v53 = vadd.f32 %v2845_v42, %v4044_v22 }
 0x4c9   : > { %v4098_v58 = vpop.f32.mrf.mxu1  ;;  %v1960_v61 = vpop.f32.mrf.mxu0  ;;  %p3017_p3 = pnand %p3016_p2, %p3010_p13 }
 0x4ca   : > { %2200 = vst.msk [vmem:[%s4064_s24 + $0x10] sm:$0xf] %vm1515_vm3, %v2573_v45  ;;  %v2576_v9 = vpack.c.bf16 %v1969_v53, %v1969_v53  ;;  %v1961_v54 = vadd.f32 %v4044_v22, %v1960_v61 }
 0x4cb   : > { %v4103_v33 = vpop.f32.mrf.mxu1  ;;  %v2848_v37 = vpop.f32.mrf.mxu0 }
 0x4cc   : > { %2203 = vst.msk [vmem:[%s4064_s24 + $0x1c] sm:$0xf] %vm1515_vm3, %v2576_v9  ;;  %v2574_v39 = vpack.c.bf16 %v1961_v54, %v1961_v54  ;;  %v1982_v60 = vadd.f32 %v2848_v37, %v4044_v22 }
 0x4cd   : > { %v4108_v63 = vpop.f32.mrf.mxu1  ;;  %v1973_v47 = vpop.f32.mrf.mxu0 }
 0x4ce   : > { %2201 = vst.msk [vmem:[%s4064_s24 + $0x14] sm:$0xf] %vm1515_vm3, %v2574_v39  ;;  %v2579_v4 = vpack.c.bf16 %v1982_v60, %v1982_v60  ;;  %v1974_v6 = vadd.f32 %v4044_v22, %v1973_v47 }
 0x4cf   : > { %v4113_v50 = vpop.f32.mrf.mxu1  ;;  %v2849_v18 = vpop.f32.mrf.mxu0 }
 0x4d0   : > { %2206 = vst.msk [vmem:[%s4064_s24 + $0x28] sm:$0xf] %vm1515_vm3, %v2579_v4  ;;  %v2577_v52 = vpack.c.bf16 %v1974_v6, %v1974_v6  ;;  %v1985_v5 = vadd.f32 %v2849_v18, %v4044_v22  ;;  %v1630_v6 = vadd.f32 %v4052_v55, %v4149_v38  ;;  %v1633_v55 = vadd.f32 %v4073_v3, %v4149_v38 }
 0x4d1   : > { %v4118_v56 = vpop.f32.mrf.mxu1  ;;  %v1976_v59 = vpop.f32.mrf.mxu0  ;;  %v1638_v3 = vadd.f32 %v4149_v38, %v4088_v34  ;;  %v1641_v34 = vadd.f32 %v4149_v38, %v4098_v58  ;;  %v1646_v58 = vadd.f32 %v4083_v25, %v4149_v38  ;;  %v1649_v25 = vadd.f32 %v4093_v7, %v4149_v38 }
 0x4d2   : > { %2204 = vst.msk [vmem:[%s4064_s24 + $0x20] sm:$0xf] %vm1515_vm3, %v2577_v52  ;;  %v2580_v19 = vpack.c.bf16 %v1985_v5, %v1985_v5  ;;  %v1977_v0 = vadd.f32 %v4044_v22, %v1976_v59 }
 0x4d3   : > { %v4123_v14 = vpop.f32.mrf.mxu1  ;;  %v2852_v20 = vpop.f32.mrf.mxu0 }
 0x4d4   : > { %2207 = vst.msk [vmem:[%s4064_s24 + $0x2c] sm:$0xf] %vm1515_vm3, %v2580_v19  ;;  %v2578_v8 = vpack.c.bf16 %v1977_v0, %v1977_v0  ;;  %v1998_v23 = vadd.f32 %v2852_v20, %v4044_v22 }
 0x4d5   : > { %v4128_v26 = vpop.f32.mrf.mxu1  ;;  %v1989_v11 = vpop.f32.mrf.mxu0 }
 0x4d6   : > { %2205 = vst.msk [vmem:[%s4064_s24 + $0x24] sm:$0xf] %vm1515_vm3, %v2578_v8  ;;  %v2583_v62 = vpack.c.bf16 %v1998_v23, %v1998_v23  ;;  %v1990_v13 = vadd.f32 %v4044_v22, %v1989_v11 }
 0x4d7   : > { %v4133_v15 = vpop.f32.mrf.mxu1  ;;  %v2853_v27 = vpop.f32.mrf.mxu0 }
 0x4d8   : > { %2210 = vst.msk [vmem:[%s4064_s24 + $0x38] sm:$0xf] %vm1515_vm3, %v2583_v62  ;;  %v2581_v32 = vpack.c.bf16 %v1990_v13, %v1990_v13  ;;  %v2001_v16 = vadd.f32 %v2853_v27, %v4044_v22 }
 0x4d9   : > { %v4138_v2 = vpop.f32.mrf.mxu1  ;;  %v1992_v28 = vpop.f32.mrf.mxu0 }
 0x4da   : > { %2208 = vst.msk [vmem:[%s4064_s24 + $0x30] sm:$0xf] %vm1515_vm3, %v2581_v32  ;;  %v2584_v10 = vpack.c.bf16 %v2001_v16, %v2001_v16  ;;  %v1993_v29 = vadd.f32 %v4044_v22, %v1992_v28 }
 0x4db   : > { %v2816_v17 = vpop.f32.mrf.mxu1  ;;  %v2856_v35 = vpop.f32.mrf.mxu0 }
 0x4dc   : > { %2211 = vst.msk [vmem:[%s4064_s24 + $0x3c] sm:$0xf] %vm1515_vm3, %v2584_v10  ;;  %v2582_v40 = vpack.c.bf16 %v1993_v29, %v1993_v29  ;;  %v2014_v36 = vadd.f32 %v2856_v35, %v4044_v22  ;;  %v1694_v37 = vadd.f32 %v2816_v17, %v4149_v38 }
 0x4dd   : > { %v1685_v1 = vpop.f32.mrf.mxu1  ;;  %v2005_v24 = vpop.f32.mrf.mxu0 }
 0x4de   : > { %2209 = vst.msk [vmem:[%s4064_s24 + $0x34] sm:$0xf] %vm1515_vm3, %v2582_v40  ;;  %v2587_v51 = vpack.c.bf16 %v2014_v36, %v2014_v36  ;;  %v1686_v30 = vadd.f32 %v4149_v38, %v1685_v1  ;;  %v2006_v21 = vadd.f32 %v4044_v22, %v2005_v24  ;;  %v2925_v20 = vpack.i.bf16 %v1694_v37, %v1630_v6 }
 0x4df   : > { %v2817_v31 = vpop.f32.mrf.mxu1  ;;  %v2857_v57 = vpop.f32.mrf.mxu0 }
 0x4e0   : > { %2214 = vst.msk [vmem:[%s4064_s24 + $0x48] sm:$0xf] %vm1515_vm3, %v2587_v51  ;;  %v2585_v49 = vpack.c.bf16 %v2006_v21, %v2006_v21  ;;  %v2017_v41 = vadd.f32 %v2857_v57, %v4044_v22  ;;  %v2921_v43 = vpack.i.bf16 %v1686_v30, %v1622_v48  ;;  %v1697_v59 = vadd.f32 %v2817_v31, %v4149_v38 }
 0x4e1   : > { %v1688_v46 = vpop.f32.mrf.mxu1  ;;  %v2008_v42 = vpop.f32.mrf.mxu0 }
 0x4e2   : > { %2212 = vst.msk [vmem:[%s4064_s24 + $0x40] sm:$0xf] %vm1515_vm3, %v2585_v49  ;;  %v2588_v45 = vpack.c.bf16 %v2017_v41, %v2017_v41  ;;  %v1689_v53 = vadd.f32 %v4149_v38, %v1688_v46  ;;  %v2009_v61 = vadd.f32 %v4044_v22, %v2008_v42  ;;  %2922 = vxpose.xlu0.b32.start [1/16] (narrow) %v2921_v43, 64 }
 0x4e3   : > { %v2820_v9 = vpop.f32.mrf.mxu1  ;;  %v2860_v54 = vpop.f32.mrf.mxu0  ;;  %v2927_v28 = vpack.i.bf16 %v1697_v59, %v1633_v55  ;;  %v1654_v59 = vadd.f32 %v4149_v38, %v4108_v63  ;;  %v1662_v55 = vadd.f32 %v4103_v33, %v4149_v38 }
 0x4e4   : > { %2215 = vst.msk [vmem:[%s4064_s24 + $0x4c] sm:$0xf] %vm1515_vm3, %v2588_v45  ;;  %v2586_v39 = vpack.c.bf16 %v2009_v61, %v2009_v61  ;;  %v2030_v60 = vadd.f32 %v2860_v54, %v4044_v22  ;;  %v2923_v44 = vpack.i.bf16 %v1689_v53, %v1625_v12  ;;  %v1710_v49 = vadd.f32 %v2820_v9, %v4149_v38 }
 0x4e5   : > { %v1701_v47 = vpop.f32.mrf.mxu1  ;;  %v2021_v4 = vpop.f32.mrf.mxu0 }
 0x4e6   : > { %2213 = vst.msk [vmem:[%s4064_s24 + $0x44] sm:$0xf] %vm1515_vm3, %v2586_v39  ;;  %v2591_v18 = vpack.c.bf16 %v2030_v60, %v2030_v60  ;;  %v2022_v52 = vadd.f32 %v4044_v22, %v2021_v4  ;;  %2924 = vxpose.xlu0.b32.cont [2/16] (narrow) %v2923_v44, 64  ;;  %v1702_v27 = vadd.f32 %v4149_v38, %v1701_v47 }
 0x4e7   : > { %v2861_v5 = vpop.f32.mrf.mxu0  ;;  %v2821_v8 = vpop.f32.mrf.mxu1  ;;  %v2933_v39 = vpack.i.bf16 %v1710_v49, %v1646_v58 }
 0x4e8   : > { %2218 = vst.msk [vmem:[%s4064_s24 + $0x58] sm:$0xf] %vm1515_vm3, %v2591_v18  ;;  %v2589_v19 = vpack.c.bf16 %v2022_v52, %v2022_v52  ;;  %v2033_v0 = vadd.f32 %v2861_v5, %v4044_v22  ;;  %v2929_v48 = vpack.i.bf16 %v1702_v27, %v1638_v3  ;;  %v1713_v9 = vadd.f32 %v2821_v8, %v4149_v38 }
 0x4e9   : > { %v2024_v23 = vpop.f32.mrf.mxu0  ;;  %v1704_v10 = vpop.f32.mrf.mxu1  ;;  %v1678_v3 = vadd.f32 %v4123_v14, %v4149_v38 }
 0x4ea   : > { %2216 = vst.msk [vmem:[%s4064_s24 + $0x50] sm:$0xf] %vm1515_vm3, %v2589_v19  ;;  %v2592_v11 = vpack.c.bf16 %v2033_v0, %v2033_v0  ;;  %v2025_v62 = vadd.f32 %v4044_v22, %v2024_v23  ;;  %2926 = vxpose.xlu0.b32.cont [3/16] (narrow) %v2925_v20, 64  ;;  %v1705_v36 = vadd.f32 %v4149_v38, %v1704_v10 }
 0x4eb   : > { %v2864_v13 = vpop.f32.mrf.mxu0  ;;  %v2824_v51 = vpop.f32.mrf.mxu1  ;;  %v2935_v52 = vpack.i.bf16 %v1713_v9, %v1649_v25  ;;  %v1673_v10 = vadd.f32 %v4149_v38, %v4138_v2 }
 0x4ec   : > { %2219 = vst.msk [vmem:[%s4064_s24 + $0x5c] sm:$0xf] %vm1515_vm3, %v2592_v11  ;;  %v2590_v32 = vpack.c.bf16 %v2025_v62, %v2025_v62  ;;  %v2046_v16 = vadd.f32 %v2864_v13, %v4044_v22  ;;  %v2931_v46 = vpack.i.bf16 %v1705_v36, %v1641_v34  ;;  %v1726_v20 = vadd.f32 %v2824_v51, %v4149_v38 }
 0x4ed   : > { %v2037_v29 = vpop.f32.mrf.mxu0  ;;  %v1717_v42 = vpop.f32.mrf.mxu1  ;;  %v1665_v13 = vadd.f32 %v4113_v50, %v4149_v38 }
 0x4ee   : > { %2217 = vst.msk [vmem:[%s4064_s24 + $0x54] sm:$0xf] %vm1515_vm3, %v2590_v32  ;;  %v2595_v17 = vpack.c.bf16 %v2046_v16, %v2046_v16  ;;  %v2038_v35 = vadd.f32 %v4044_v22, %v2037_v29  ;;  %2928 = vxpose.xlu0.b32.cont [4/16] (narrow) %v2927_v28, 64  ;;  %v1718_v6 = vadd.f32 %v4149_v38, %v1717_v42 }
 0x4ef   : > { %v2865_v40 = vpop.f32.mrf.mxu0  ;;  %v2825_v60 = vpop.f32.mrf.mxu1  ;;  %v2941_v11 = vpack.i.bf16 %v1726_v20, %v1662_v55  ;;  %v1670_v16 = vadd.f32 %v4149_v38, %v4128_v26 }
 0x4f0   : > { %2222 = vst.msk [vmem:[%s4064_s24 + $0x68] sm:$0xf] %vm1515_vm3, %v2595_v17  ;;  %v2593_v1 = vpack.c.bf16 %v2038_v35, %v2038_v35  ;;  %v2049_v24 = vadd.f32 %v2865_v40, %v4044_v22  ;;  %v2937_v19 = vpack.i.bf16 %v1718_v6, %v1654_v59  ;;  %v1729_v63 = vadd.f32 %v2825_v60, %v4149_v38 }
 0x4f1   : > { %v2040_v30 = vpop.f32.mrf.mxu0  ;;  %v1720_v5 = vpop.f32.mrf.mxu1  ;;  %v1681_v35 = vadd.f32 %v4133_v15, %v4149_v38 }
 0x4f2   : > { %2220 = vst.msk [vmem:[%s4064_s24 + $0x60] sm:$0xf] %vm1515_vm3, %v2593_v1  ;;  %v2596_v21 = vpack.c.bf16 %v2049_v24, %v2049_v24  ;;  %v2041_v31 = vadd.f32 %v4044_v22, %v2040_v30  ;;  %2930 = vxpose.xlu0.b32.cont [5/16] (narrow) %v2929_v48, 64  ;;  %v1721_v7 = vadd.f32 %v4149_v38, %v1720_v5 }
 0x4f3   : > { %v2868_v57 = vpop.f32.mrf.mxu0  ;;  %v2828_v0 = vpop.f32.mrf.mxu1 }
 0x4f4   : > { %2223 = vst.msk [vmem:[%s4064_s24 + $0x6c] sm:$0xf] %vm1515_vm3, %v2596_v21  ;;  %v2594_v41 = vpack.c.bf16 %v2041_v31, %v2041_v31  ;;  %v2062_v43 = vadd.f32 %v2868_v57, %v4044_v22  ;;  %v1742_v50 = vadd.f32 %v2828_v0, %v4149_v38 }
 0x4f5   : > { %v2053_v12 = vpop.f32.mrf.mxu0  ;;  %v1733_v23 = vpop.f32.mrf.mxu1 }
 0x4f6   : > { %2221 = vst.msk [vmem:[%s4064_s24 + $0x64] sm:$0xf] %vm1515_vm3, %v2594_v41  ;;  %v2599_v45 = vpack.c.bf16 %v2062_v43, %v2062_v43  ;;  %v2054_v53 = vadd.f32 %v4044_v22, %v2053_v12  ;;  %2932 = vxpose.xlu0.b32.cont [6/16] (narrow) %v2931_v46, 64  ;;  %v1734_v27 = vadd.f32 %v4149_v38, %v1733_v23 }
 0x4f7   : > { %v2869_v61 = vpop.f32.mrf.mxu0  ;;  %v2829_v62 = vpop.f32.mrf.mxu1  ;;  %v2949_v26 = vpack.i.bf16 %v1742_v50, %v1678_v3 }
 0x4f8   : > { %2226 = vst.msk [vmem:[%s4064_s24 + $0x78] sm:$0xf] %vm1515_vm3, %v2599_v45  ;;  %v2597_v54 = vpack.c.bf16 %v2054_v53, %v2054_v53  ;;  %v2065_v37 = vadd.f32 %v2869_v61, %v4044_v22  ;;  %v2945_v28 = vpack.i.bf16 %v1734_v27, %v1670_v16  ;;  %v1745_v17 = vadd.f32 %v2829_v62, %v4149_v38 }
 0x4f9   : > { %v2056_v44 = vpop.f32.mrf.mxu0  ;;  %v1736_v32 = vpop.f32.mrf.mxu1 }
 0x4fa   : > { %2224 = vst.msk [vmem:[%s4064_s24 + $0x70] sm:$0xf] %vm1515_vm3, %v2597_v54  ;;  %v2600_v47 = vpack.c.bf16 %v2065_v37, %v2065_v37  ;;  %v2057_v4 = vadd.f32 %v4044_v22, %v2056_v44  ;;  %2934 = vxpose.xlu0.b32.cont [7/16] (narrow) %v2933_v39, 64  ;;  %v1657_v22 = vadd.f32 %v4149_v38, %v4118_v56 }
 0x4fb   : > { %v2943_v56 = vpack.i.bf16 %v1729_v63, %v1665_v13  ;;  %v1737_v33 = vadd.f32 %v4149_v38, %v1736_v32  ;;  %v2951_v40 = vpack.i.bf16 %v1745_v17, %v1681_v35 }
 0x4fc   : > { %2227 = vst.msk [vmem:[%s4064_s24 + $0x7c] sm:$0xf] %vm1515_vm3, %v2600_v47  ;;  %v2598_v18 = vpack.c.bf16 %v2057_v4, %v2057_v4  ;;  %v2939_v8 = vpack.i.bf16 %v1721_v7, %v1657_v22 }
 0x4fd   : > { %v2947_v29 = vpack.i.bf16 %v1737_v33, %v1673_v10 }
 0x4fe   : > { %2225 = vst.msk [vmem:[%s4064_s24 + $0x74] sm:$0xf] %vm1515_vm3, %v2598_v18  ;;  %2936 = vxpose.xlu0.b32.cont [8/16] (narrow) %v2935_v52, 64 }
 0x502   : > { %2938 = vxpose.xlu0.b32.cont [9/16] (narrow) %v2937_v19, 64 }
 0x506   : > { %2940 = vxpose.xlu0.b32.cont [10/16] (narrow) %v2939_v8, 64 }
 0x50a   : > { %2942 = vxpose.xlu0.b32.cont [11/16] (narrow) %v2941_v11, 64 }
 0x50e   : > { %2944 = vxpose.xlu0.b32.cont [12/16] (narrow) %v2943_v56, 64 }
 0x512   : > { %2946 = vxpose.xlu0.b32.cont [13/16] (narrow) %v2945_v28, 64 }
 0x516   : > { %2948 = vxpose.xlu0.b32.cont [14/16] (narrow) %v2947_v29, 64 }
 0x51a   : > { %2950 = vxpose.xlu0.b32.cont [15/16] (narrow) %v2949_v26, 64 }
 0x51e   : > { %2952 = vxpose.xlu0.b32.end [16/16] (narrow) %v2951_v40, 64 }
 0x55e   : > { %v2953_v2 = vpop.trf.xlu0 }
 0x55f   : > { %v2957_v36 = vunpack.i.h.bf16 %v2953_v2  ;;  %v2954_v1 = vunpack.i.l.bf16 %v2953_v2 }
 0x561   : > { %v2561_v24 = vpack.c.bf16 %v2957_v36, %v2954_v1 }
 0x562   : > { %v2958_v48 = vpop.trf.xlu0 }
 0x563   : > { %1860 = vst [vmem:[%s4251_s20] sm:$0xff] %v2561_v24  ;;  %v2962_v14 = vunpack.i.h.bf16 %v2958_v48  ;;  %v2959_v15 = vunpack.i.l.bf16 %v2958_v48 }
 0x565   : > { %v2562_v38 = vpack.c.bf16 %v2962_v14, %v2959_v15 }
 0x566   : > { %v2963_v51 = vpop.trf.xlu0 }
 0x567   : > { %1861 = vst [vmem:[%s4251_s20 + $0x8] sm:$0xff] %v2562_v38  ;;  %v2967_v30 = vunpack.i.h.bf16 %v2963_v51  ;;  %v2964_v34 = vunpack.i.l.bf16 %v2963_v51 }
 0x569   : > { %v2563_v21 = vpack.c.bf16 %v2967_v30, %v2964_v34 }
 0x56a   : > { %v2968_v31 = vpop.trf.xlu0 }
 0x56b   : > { %1862 = vst [vmem:[%s4251_s20 + $0x10] sm:$0xff] %v2563_v21  ;;  %v2972_v57 = vunpack.i.h.bf16 %v2968_v31  ;;  %v2969_v49 = vunpack.i.l.bf16 %v2968_v31 }
 0x56d   : > { %v2564_v41 = vpack.c.bf16 %v2972_v57, %v2969_v49 }
 0x56e   : > { %v2973_v43 = vpop.trf.xlu0 }
 0x56f   : > { %1863 = vst [vmem:[%s4251_s20 + $0x18] sm:$0xff] %v2564_v41  ;;  %v2977_v46 = vunpack.i.h.bf16 %v2973_v43  ;;  %v2974_v42 = vunpack.i.l.bf16 %v2973_v43 }
 0x571   : > { %v2565_v12 = vpack.c.bf16 %v2977_v46, %v2974_v42 }
 0x572   : > { %v2978_v58 = vpop.trf.xlu0 }
 0x573   : > { %1864 = vst [vmem:[%s4251_s20 + $0x20] sm:$0xff] %v2565_v12  ;;  %v2982_v45 = vunpack.i.h.bf16 %v2978_v58  ;;  %v2979_v53 = vunpack.i.l.bf16 %v2978_v58 }
 0x575   : > { %v2566_v61 = vpack.c.bf16 %v2982_v45, %v2979_v53 }
 0x576   : > { %v2983_v9 = vpop.trf.xlu0 }
 0x577   : > { %1865 = vst [vmem:[%s4251_s20 + $0x28] sm:$0xff] %v2566_v61  ;;  %v2987_v54 = vunpack.i.h.bf16 %v2983_v9  ;;  %v2984_v37 = vunpack.i.l.bf16 %v2983_v9 }
 0x579   : > { %v2567_v39 = vpack.c.bf16 %v2987_v54, %v2984_v37 }
 0x57a   : > { %v2988_v60 = vpop.trf.xlu0 }
 0x57b   : > { %1866 = vst [vmem:[%s4251_s20 + $0x30] sm:$0xff] %v2567_v39  ;;  %v2992_v44 = vunpack.i.h.bf16 %v2988_v60  ;;  %v2989_v25 = vunpack.i.l.bf16 %v2988_v60 }
 0x57d   : > { %v2568_v47 = vpack.c.bf16 %v2992_v44, %v2989_v25 }
 0x57f   : > { %1867 = vst [vmem:[%s4251_s20 + $0x38] sm:$0xff] %v2568_v47 }
 0x580   : > { %3020 = shalt.err (!%p3017_p3)
}
 0x581   : > { %s3021_s30 = scalar_lea.hbm %s4265_s23, 1024  ;;  %s3025_s0 = scalar_lea.hbm %s4324_s12, 2048 }
 0x582   : > { %p3022_p4 = scmp.ne.s32.totalorder %s4265_s23, %s3021_s30  ;;  %p3026_p9 = scmp.lt.s32.totalorder %s4265_s23, %s4324_s12 }
 0x583   : > { %p3027_p10 = scmp.lt.s32.totalorder %s3025_s0, %s3021_s30 }
 0x584   : > { %p3023_p7 = pnand %p3022_p4, %p3182_p5 }
 0x585   : > { %p3028_p11 = por %p3027_p10, %p3026_p9 }
 0x586   : > { %p3024_p8 = pneg %p3023_p7 }
 0x588   : > { %p3029_p12 = pnand %p3028_p11, %p3024_p8 }
 0x58a   : > { %3032 = shalt.err (!%p3029_p12)
}
 0x58b   : > { %s3072_s1 = smov 128   ;;  %s3073_s29 = smov 8  }
 0x58c   : > { %2878 = dma.vmem_to_hbm [thread:$0]  (%p3182_p5), %s4267_s21, 1024, %s4265_s23, %s4272_s16, %s3072_s1, %s3072_s1, %s3073_s29  }
 0x58d PF: > { %p2884_p13 = scmp.ge.s32.totalorder %s3067_s28, 2  ;;  %s2281_s22 = sand.u32 1, %s3055_s25  }
 0x58e   : > { %s2282_s2 = scalar_lea.sflag [#allocation3], %s2281_s22 }
 0x58f   : > { %p2881_p0 = pnand %p2884_p13, %p3186_p6 }
 0x591   : > { %p2882_p1 = pneg %p2881_p0 }
 0x593   : > { %3050 = dma.done.wait (%p2882_p1), %s2282_s2, 1024  }
 0x594   : > { %3052 = vsyncadd (%p2882_p1), %s2282_s2, 4294966272  ;;  %p24_p2 = scmp.ge.s32.totalorder %s3169_s14, 4   ;;  %s4334_s25 = smov %s3059_s26 }
 0x595   : > { %s4335_s26 = smov %s3063_s27  ;;  %s4336_s27 = smov %s3180_s17 }
 0x596   : > { %s4337_s28 = smov %s3169_s14  ;;  %26 = sbr.rel (!%p24_p2) target bundleno = 7 (0x7), region = 123 }
 0x59b   :  { %2295 = vsyncpa [#allocation3], 1 }
 0x59c   :  { %2297 = vsyncpa [#allocation3 + $0x1], 1 }

</bundles_post_ra>
